<compile_context>
chip_gen: v7x
topology: tpu7x:2x2x1
jax: 0.10.0
libtpu: 0.0.40
codegen_flags: <defaults>
</compile_context>

<pallas_src>
import jax
import jax.numpy as jnp
from jax.experimental import pallas as pl
from jax.experimental.pallas import tpu as pltpu


def _round_up(x, m):
    return ((x + m - 1) // m) * m


def make_encoder_kernel(T, B, CT, CB, Hp):
    """Builds the per-(batch-chunk, time-chunk) kernel body (closure over static shapes)."""

    def kernel(tok_ref, emb_hbm, wih_ref, whh_ref, bx_ref, bhn_ref,
               out_ref, hid_ref, h_ref, ebuf_ref, gsem):
        # tok_ref:  (T*B,)      int32  SMEM (scalar prefetch), time-major (row t*B + b)
        # emb_hbm:  (V, Hp)     f32    HBM (pl.ANY) embedding table
        # wih_ref:  (Hp, 3*Hp)  f32    W_ih^T gate-split [r|z|n], zero-padded
        # whh_ref:  (Hp, 3*Hp)  f32/bf16  W_hh^T gate-split, zero-padded
        # bx_ref:   (1, 3*Hp)   f32    b_ih with b_hh[r], b_hh[z] folded in
        # bhn_ref:  (1, Hp)     f32    b_hh n-gate
        # out_ref:  (CT,CB,Hp)  f32    this chunk's hidden states (time-major block)
        # hid_ref:  (CB, Hp)    f32    final hidden state for this batch chunk
        # h_ref:    (CB, Hp)    f32    persistent carried hidden state (scratch)
        # ebuf_ref: (CT*CB,Hp)  f32    gathered embedding rows (scratch)
        # gsem:     (CT*CB,)    DMA semaphores for the gather
        bi = pl.program_id(0)          # batch-chunk axis ("parallel")
        ti = pl.program_id(1)          # time-chunk axis ("arbitrary", sequential)

        # New sequence sweep for this batch chunk: reset the carried hidden state.
        @pl.when(ti == 0)
        def _():
            h_ref[...] = jnp.zeros_like(h_ref)

        # ---- Embedding lookup: DMA row gather straight from HBM -------------
        # Out-of-range token ids would fault the bounds-checked DMA (closest
        # analogue to nn.Embedding raising); inputs are assumed validated.
        rows = CT * CB
        t0 = ti * CT
        b0 = bi * CB
        copies = []
        for row in range(rows):                       # static, tiny unroll
            t_loc, b_loc = row // CB, row % CB
            tok = tok_ref[(t0 + t_loc) * B + b0 + b_loc]
            cp = pltpu.make_async_copy(
                emb_hbm.at[pl.ds(tok, 1), :],         # (1, Hp) row in HBM
                ebuf_ref.at[pl.ds(row, 1), :],        # (1, Hp) row in VMEM
                gsem.at[row])
            cp.start()
            copies.append(cp)
        for cp in copies:
            cp.wait()
        # TODO(synk): double-buffer ebuf and issue chunk ti+1's gathers before
        # chunk ti's recurrence so the gather latency is fully hidden.

        # TODO(synk): dropout is identity here (inference); training-mode dropout
        # would use pltpu.prng_seed + pltpu.prng_random_bits on the gathered rows.

        # ---- Input projections for the whole chunk: one MXU matmul ----------
        # bx already contains b_ih plus the r/z slices of b_hh, so the serial
        # recurrence only needs the n-gate bhn below.
        xproj = (jnp.dot(ebuf_ref[...], wih_ref[...],
                         preferred_element_type=jnp.float32)
                 + bx_ref[...])                       # (rows, 3*Hp) f32
        # TODO(synk): at larger chunk sizes, stage xproj in a VMEM scratch (and
        # optionally bf16) instead of keeping it live in vregs.

        whh = whh_ref[...]                            # (Hp, 3*Hp) f32 or bf16
        bhn = bhn_ref[...]                            # (1, Hp)
        h = h_ref[...]                                # (CB, Hp) f32

        # ---- GRU recurrence over the chunk (unroll bounded by CT) -----------
        outs = []
        for t in range(CT):
            xp = xproj[t * CB:(t + 1) * CB, :]        # static slice of a value
            hp = jnp.dot(h.astype(whh.dtype), whh,
                         preferred_element_type=jnp.float32)       # (CB, 3*Hp)
            # sigmoid(x) == 0.5*(tanh(x/2)+1): one EUP op + 2 VPU ops per gate.
            r = 0.5 * (jnp.tanh(0.5 * (xp[:, :Hp] + hp[:, :Hp])) + 1.0)
            z = 0.5 * (jnp.tanh(0.5 * (xp[:, Hp:2 * Hp] + hp[:, Hp:2 * Hp])) + 1.0)
            n = jnp.tanh(xp[:, 2 * Hp:] + r * (hp[:, 2 * Hp:] + bhn))
            h = (1.0 - z) * n + z * h
            outs.append(h)

        # One batched store per chunk instead of CT sublane-masked stores.
        out_ref[...] = jnp.stack(outs, axis=0).astype(out_ref.dtype)
        h_ref[...] = h                                # carried to next time chunk
        hid_ref[...] = h.astype(hid_ref.dtype)        # last chunk's value survives

    return kernel


def _pack_gru_weight(w, H, Hp):
    """PyTorch-stacked (3H, H) [r,z,n] -> (Hp, 3*Hp): per-gate transpose + zero-pad."""
    cols = []
    for g in range(3):
        wg_t = jnp.transpose(w[g * H:(g + 1) * H, :])          # (H_in, H_out)
        cols.append(jnp.pad(wg_t, ((0, Hp - H), (0, Hp - H))))
    return jnp.concatenate(cols, axis=1)


def _pack_bias(b, H, Hp):
    """(3H,) [r,z,n] -> (1, 3*Hp), per-gate zero-padded."""
    cols = [jnp.pad(b[g * H:(g + 1) * H], (0, Hp - H)) for g in range(3)]
    return jnp.concatenate(cols).reshape(1, 3 * Hp)


def encoder_forward(tokens, emb, w_ih, w_hh, b_ih, b_hh, *,
                    recurrent_dtype=jnp.bfloat16, t_chunk=None, b_chunk=None):
    """tokens: (B, T) int32.  Returns (output (B,T,H), hidden (1,B,H)), matching
    PyTorch nn.GRU(batch_first=True) with zero initial hidden (eval-mode dropout)."""
    B, T = tokens.shape
    V, H = emb.shape
    Hp = _round_up(H, 128)

    if t_chunk is None:
        t_chunk = next(c for c in (8, 4, 2, 1) if T % c == 0)
    if b_chunk is None:
        b_chunk = B           # set to B//2 (a multiple of 8) to use both v7x TensorCores
    assert T % t_chunk == 0 and B % b_chunk == 0
    # (8,128) layout rule on the (b_chunk, Hp) trailing tile of the output block:
    assert b_chunk == B or b_chunk % 8 == 0
    nb, nt = B // b_chunk, T // t_chunk

    # One-time layout plumbing in XLA: transpose + gate-split + zero-pad so every
    # gate slice in the kernel is a full 128-lane slab and padded lanes stay 0.
    emb_p = jnp.pad(emb.astype(jnp.float32), ((0, 0), (0, Hp - H)))   # rows not padded: gathered exactly
    wih_t = _pack_gru_weight(w_ih.astype(jnp.float32), H, Hp)
    whh_t = _pack_gru_weight(w_hh.astype(jnp.float32), H, Hp).astype(recurrent_dtype)
    b_ih = b_ih.astype(jnp.float32)
    b_hh = b_hh.astype(jnp.float32)
    # Fold b_hh[r], b_hh[z] into the input-side bias; only bhn stays per-step.
    bx = _pack_bias(jnp.concatenate([b_ih[:2 * H] + b_hh[:2 * H], b_ih[2 * H:]]), H, Hp)
    bhn = jnp.pad(b_hh[2 * H:], (0, Hp - H)).reshape(1, Hp)

    # Time-major flattened tokens (row t*B + b) -> SMEM via scalar prefetch.
    tokens_flat = jnp.transpose(tokens, (1, 0)).reshape(T * B).astype(jnp.int32)

    kernel = make_encoder_kernel(T, B, t_chunk, b_chunk, Hp)

    # Size the scoped-VMEM limit to actual residency (v5e default is only 16 MiB).
    wdt = jnp.dtype(recurrent_dtype).itemsize
    resident = (4 * Hp * 3 * Hp + wdt * Hp * 3 * Hp + 4 * 4 * Hp          # weights + biases
                + 2 * 4 * t_chunk * b_chunk * Hp                          # out (double-buffered)
                + 2 * 4 * b_chunk * Hp + 4 * b_chunk * Hp                 # hid + h scratch
                + 4 * t_chunk * b_chunk * Hp                              # gather buffer
                + 4 * t_chunk * b_chunk * 3 * Hp)                         # xproj temporaries
    vmem_limit = int(min(100 * 2**20, max(16 * 2**20, 2 * resident + 4 * 2**20)))

    out_tm, hid_p = pl.pallas_call(
        kernel,
        out_shape=(
            jax.ShapeDtypeStruct((T, B, Hp), jnp.float32),
            jax.ShapeDtypeStruct((B, Hp), jnp.float32),
        ),
        grid_spec=pltpu.PrefetchScalarGridSpec(
            num_scalar_prefetch=1,
            grid=(nb, nt),
            in_specs=[
                pl.BlockSpec(memory_space=pl.ANY),                        # emb stays in HBM
                pl.BlockSpec((Hp, 3 * Hp), lambda bi, ti, tok: (0, 0)),   # W_ih^T (resident)
                pl.BlockSpec((Hp, 3 * Hp), lambda bi, ti, tok: (0, 0)),   # W_hh^T (resident)
                pl.BlockSpec((1, 3 * Hp), lambda bi, ti, tok: (0, 0)),    # folded input bias
                pl.BlockSpec((1, Hp), lambda bi, ti, tok: (0, 0)),        # b_hh n-gate
            ],
            out_specs=[
                pl.BlockSpec((t_chunk, b_chunk, Hp), lambda bi, ti, tok: (ti, bi, 0)),
                pl.BlockSpec((b_chunk, Hp), lambda bi, ti, tok: (bi, 0)),
            ],
            scratch_shapes=[
                pltpu.VMEM((b_chunk, Hp), jnp.float32),                   # persistent h
                pltpu.VMEM((t_chunk * b_chunk, Hp), jnp.float32),         # gathered rows
                pltpu.SemaphoreType.DMA((t_chunk * b_chunk,)),            # gather sems
            ],
        ),
        compiler_params=pltpu.CompilerParams(
            dimension_semantics=("parallel", "arbitrary"),
            vmem_limit_bytes=vmem_limit,
        ),
    )(tokens_flat, emb_p, wih_t, whh_t, bx, bhn)

    # TODO(synk): if the consumer accepts time-major / Hp-padded activations,
    # return out_tm directly and drop this extra HBM round-trip.
    output = jnp.transpose(out_tm[:, :, :H], (1, 0, 2))    # (B, T, H) batch_first
    hidden = hid_p[None, :, :H]                            # (1, B, H)
    return output, hidden


def encoder_reference(tokens, emb, w_ih, w_hh, b_ih, b_hh):
    """Pure-JAX reference of the PyTorch Encoder forward (eval mode)."""
    B, T = tokens.shape
    H = emb.shape[1]
    x = emb[tokens]                                         # (B, T, H)
    xp_all = jnp.einsum('bth,gh->btg', x, w_ih) + b_ih      # (B, T, 3H)

    def step(h, xp):                                        # xp: (B, 3H)
        hp = h @ w_hh.T + b_hh
        r = jax.nn.sigmoid(xp[:, :H] + hp[:, :H])
        z = jax.nn.sigmoid(xp[:, H:2 * H] + hp[:, H:2 * H])
        n = jnp.tanh(xp[:, 2 * H:] + r * hp[:, 2 * H:])
        h_new = (1.0 - z) * n + z * h
        return h_new, h_new

    h0 = jnp.zeros((B, H), jnp.float32)
    h_last, outs = jax.lax.scan(step, h0, jnp.transpose(xp_all, (1, 0, 2)))
    return jnp.transpose(outs, (1, 0, 2)), h_last[None]


if __name__ == "__main__":
    # Small shapes consistent with the module: vocab V=16, hidden H=32, B=2, T=8.
    V, H, B, T = 16, 32, 2, 8

    key = jax.random.PRNGKey(0)
    k_emb, k_wih, k_whh, k_bih, k_bhh, k_tok = jax.random.split(key, 6)

    # Deterministic init mimicking PyTorch defaults:
    #   nn.Embedding: N(0, 1); nn.GRU: U(-1/sqrt(H), 1/sqrt(H))
    bound = 1.0 / jnp.sqrt(jnp.float32(H))
    emb = jax.random.normal(k_emb, (V, H), jnp.float32)
    w_ih = jax.random.uniform(k_wih, (3 * H, H), jnp.float32, -bound, bound)
    w_hh = jax.random.uniform(k_whh, (3 * H, H), jnp.float32, -bound, bound)
    b_ih = jax.random.uniform(k_bih, (3 * H,), jnp.float32, -bound, bound)
    b_hh = jax.random.uniform(k_bhh, (3 * H,), jnp.float32, -bound, bound)
    tokens = jax.random.randint(k_tok, (B, T), 0, V, jnp.int32)

    ref_out, ref_hid = encoder_reference(tokens, emb, w_ih, w_hh, b_ih, b_hh)

    # Exact-precision configuration (f32 recurrent matmul): tight parity.
    # t_chunk=4 -> 2 time chunks, exercising the persistent-h carry across grid steps.
    out32, hid32 = encoder_forward(tokens, emb, w_ih, w_hh, b_ih, b_hh,
                                   recurrent_dtype=jnp.float32, t_chunk=4)
    out32, hid32 = jax.block_until_ready((out32, hid32))
    assert out32.shape == (B, T, H) and hid32.shape == (1, B, H)
    assert jnp.allclose(out32, ref_out, atol=1e-5, rtol=1e-5)
    assert jnp.allclose(hid32, ref_hid, atol=1e-5, rtol=1e-5)

    # Performance configuration: bf16 recurrent weights on the serial critical path.
    outbf, hidbf = encoder_forward(tokens, emb, w_ih, w_hh, b_ih, b_hh,
                                   recurrent_dtype=jnp.bfloat16, t_chunk=4)
    outbf, hidbf = jax.block_until_ready((outbf, hidbf))
    assert outbf.shape == (B, T, H) and hidbf.shape == (1, B, H)
    assert jnp.allclose(outbf, ref_out, atol=2e-2, rtol=2e-2)
    assert jnp.allclose(hidbf, ref_hid, atol=2e-2, rtol=2e-2)

    print("KERNEL_OK")
</pallas_src>

<mosaic_0001>
module attributes {stable_mosaic.version = 11 : i64} {
  func.func @kernel(%arg0: i32, %arg1: i32, %arg2: memref<16xi32, #tpu.memory_space<smem>>, %arg3: memref<16x128xf32, #tpu.memory_space<any>>, %arg4: memref<128x384xf32, #tpu.memory_space<vmem>>, %arg5: memref<128x384xf32, #tpu.memory_space<vmem>>, %arg6: memref<1x384xf32, #tpu.memory_space<vmem>>, %arg7: memref<1x128xf32, #tpu.memory_space<vmem>>, %arg8: memref<4x2x128xf32, #tpu.memory_space<vmem>>, %arg9: memref<2x128xf32, #tpu.memory_space<vmem>>, %arg10: memref<2x128xf32, #tpu.memory_space<vmem>>, %arg11: memref<8x128xf32, #tpu.memory_space<vmem>>, %arg12: memref<8x!tpu.dma_semaphore, #tpu.memory_space<semaphore_mem>>) attributes {dimension_semantics = [#tpu.dimension_semantics<parallel>, #tpu.dimension_semantics<arbitrary>], iteration_bounds = array<i64: 1, 2>, scalar_prefetch = 1 : i64, scratch_operands = 3 : i64, tpu.core_type = #tpu.core_type<tc>, window_params = [{}, {pipeline_mode = #tpu.pipeline_mode<synchronous>, transform_indices = @transform_1, window_bounds = array<i64: 128, 384>}, {pipeline_mode = #tpu.pipeline_mode<synchronous>, transform_indices = @transform_2, window_bounds = array<i64: 128, 384>}, {pipeline_mode = #tpu.pipeline_mode<synchronous>, transform_indices = @transform_3, window_bounds = array<i64: 1, 384>}, {pipeline_mode = #tpu.pipeline_mode<synchronous>, transform_indices = @transform_4, window_bounds = array<i64: 1, 128>}, {transform_indices = @transform_5, window_bounds = array<i64: 4, 2, 128>}, {transform_indices = @transform_6, window_bounds = array<i64: 2, 128>}]} {
    %c0_i32 = arith.constant 0 : i32
    %0 = arith.cmpi eq, %arg1, %c0_i32 : i32
    %1 = arith.extui %0 : i1 to i32
    %c0_i32_0 = arith.constant 0 : i32
    %2 = arith.cmpi ne, %1, %c0_i32_0 : i32
    scf.if %2 {
      %cst_134 = arith.constant 0.000000e+00 : f32
      %270 = vector.broadcast %cst_134 : f32 to vector<2x128xf32>
      %c0_135 = arith.constant 0 : index
      %c0_136 = arith.constant 0 : index
      %271 = vector.load %arg10[%c0_135, %c0_136] : memref<2x128xf32, #tpu.memory_space<vmem>>, vector<2x128xf32>
      tpu.vector_store %arg10[%c0_135, %c0_136], %270 {strides = array<i32>} : memref<2x128xf32, #tpu.memory_space<vmem>>, vector<2x128xf32>,
    } else {
    }
    %c4_i32 = arith.constant 4 : i32
    %3 = arith.muli %arg1, %c4_i32 : i32
    %c2_i32 = arith.constant 2 : i32
    %4 = arith.muli %arg0, %c2_i32 : i32
    %c0_i32_1 = arith.constant 0 : i32
    %5 = arith.addi %3, %c0_i32_1 : i32
    %c2_i32_2 = arith.constant 2 : i32
    %6 = arith.muli %5, %c2_i32_2 : i32
    %7 = arith.addi %6, %4 : i32
    %c0_i32_3 = arith.constant 0 : i32
    %8 = arith.addi %7, %c0_i32_3 : i32
    %9 = arith.index_cast %8 : i32 to index
    %10 = memref.load %arg2[%9] : memref<16xi32, #tpu.memory_space<smem>>
    %c0_i32_4 = arith.constant 0 : i32
    %c0_i32_5 = arith.constant 0 : i32
    %11 = tpu.memref_slice %arg3[%10, %c0_i32_5] : memref<16x128xf32, #tpu.memory_space<any>> -> memref<1x128xf32, #tpu.memory_space<any>>
    %c0_i32_6 = arith.constant 0 : i32
    %c0_i32_7 = arith.constant 0 : i32
    %12 = tpu.memref_slice %arg11[%c0_i32_6, %c0_i32_7] : memref<8x128xf32, #tpu.memory_space<vmem>> -> memref<1x128xf32, #tpu.memory_space<vmem>>
    %13 = tpu.memref_slice %arg12[%c0_i32_4] : memref<8x!tpu.dma_semaphore, #tpu.memory_space<semaphore_mem>> -> memref<1x!tpu.dma_semaphore, #tpu.memory_space<semaphore_mem>>
    %14 = tpu.memref_squeeze %13 : memref<1x!tpu.dma_semaphore, #tpu.memory_space<semaphore_mem>> -> memref<!tpu.dma_semaphore, #tpu.memory_space<semaphore_mem>>
    tpu.enqueue_dma source(%11 : memref<1x128xf32, #tpu.memory_space<any>>) target(%12 : memref<1x128xf32, #tpu.memory_space<vmem>>) target_semaphore(%14 : memref<!tpu.dma_semaphore, #tpu.memory_space<semaphore_mem>>)
    %c0_i32_8 = arith.constant 0 : i32
    %15 = arith.addi %3, %c0_i32_8 : i32
    %c2_i32_9 = arith.constant 2 : i32
    %16 = arith.muli %15, %c2_i32_9 : i32
    %17 = arith.addi %16, %4 : i32
    %c1_i32 = arith.constant 1 : i32
    %18 = arith.addi %17, %c1_i32 : i32
    %19 = arith.index_cast %18 : i32 to index
    %20 = memref.load %arg2[%19] : memref<16xi32, #tpu.memory_space<smem>>
    %c1_i32_10 = arith.constant 1 : i32
    %c0_i32_11 = arith.constant 0 : i32
    %21 = tpu.memref_slice %arg3[%20, %c0_i32_11] : memref<16x128xf32, #tpu.memory_space<any>> -> memref<1x128xf32, #tpu.memory_space<any>>
    %c1_i32_12 = arith.constant 1 : i32
    %c0_i32_13 = arith.constant 0 : i32
    %22 = tpu.memref_slice %arg11[%c1_i32_12, %c0_i32_13] : memref<8x128xf32, #tpu.memory_space<vmem>> -> memref<1x128xf32, #tpu.memory_space<vmem>>
    %23 = tpu.memref_slice %arg12[%c1_i32_10] : memref<8x!tpu.dma_semaphore, #tpu.memory_space<semaphore_mem>> -> memref<1x!tpu.dma_semaphore, #tpu.memory_space<semaphore_mem>>
    %24 = tpu.memref_squeeze %23 : memref<1x!tpu.dma_semaphore, #tpu.memory_space<semaphore_mem>> -> memref<!tpu.dma_semaphore, #tpu.memory_space<semaphore_mem>>
    tpu.enqueue_dma source(%21 : memref<1x128xf32, #tpu.memory_space<any>>) target(%22 : memref<1x128xf32, #tpu.memory_space<vmem>>) target_semaphore(%24 : memref<!tpu.dma_semaphore, #tpu.memory_space<semaphore_mem>>)
    %c1_i32_14 = arith.constant 1 : i32
    %25 = arith.addi %3, %c1_i32_14 : i32
    %c2_i32_15 = arith.constant 2 : i32
    %26 = arith.muli %25, %c2_i32_15 : i32
    %27 = arith.addi %26, %4 : i32
    %c0_i32_16 = arith.constant 0 : i32
    %28 = arith.addi %27, %c0_i32_16 : i32
    %29 = arith.index_cast %28 : i32 to index
    %30 = memref.load %arg2[%29] : memref<16xi32, #tpu.memory_space<smem>>
    %c2_i32_17 = arith.constant 2 : i32
    %c0_i32_18 = arith.constant 0 : i32
    %31 = tpu.memref_slice %arg3[%30, %c0_i32_18] : memref<16x128xf32, #tpu.memory_space<any>> -> memref<1x128xf32, #tpu.memory_space<any>>
    %c2_i32_19 = arith.constant 2 : i32
    %c0_i32_20 = arith.constant 0 : i32
    %32 = tpu.memref_slice %arg11[%c2_i32_19, %c0_i32_20] : memref<8x128xf32, #tpu.memory_space<vmem>> -> memref<1x128xf32, #tpu.memory_space<vmem>>
    %33 = tpu.memref_slice %arg12[%c2_i32_17] : memref<8x!tpu.dma_semaphore, #tpu.memory_space<semaphore_mem>> -> memref<1x!tpu.dma_semaphore, #tpu.memory_space<semaphore_mem>>
    %34 = tpu.memref_squeeze %33 : memref<1x!tpu.dma_semaphore, #tpu.memory_space<semaphore_mem>> -> memref<!tpu.dma_semaphore, #tpu.memory_space<semaphore_mem>>
    tpu.enqueue_dma source(%31 : memref<1x128xf32, #tpu.memory_space<any>>) target(%32 : memref<1x128xf32, #tpu.memory_space<vmem>>) target_semaphore(%34 : memref<!tpu.dma_semaphore, #tpu.memory_space<semaphore_mem>>)
    %c1_i32_21 = arith.constant 1 : i32
    %35 = arith.addi %3, %c1_i32_21 : i32
    %c2_i32_22 = arith.constant 2 : i32
    %36 = arith.muli %35, %c2_i32_22 : i32
    %37 = arith.addi %36, %4 : i32
    %c1_i32_23 = arith.constant 1 : i32
    %38 = arith.addi %37, %c1_i32_23 : i32
    %39 = arith.index_cast %38 : i32 to index
    %40 = memref.load %arg2[%39] : memref<16xi32, #tpu.memory_space<smem>>
    %c3_i32 = arith.constant 3 : i32
    %c0_i32_24 = arith.constant 0 : i32
    %41 = tpu.memref_slice %arg3[%40, %c0_i32_24] : memref<16x128xf32, #tpu.memory_space<any>> -> memref<1x128xf32, #tpu.memory_space<any>>
    %c3_i32_25 = arith.constant 3 : i32
    %c0_i32_26 = arith.constant 0 : i32
    %42 = tpu.memref_slice %arg11[%c3_i32_25, %c0_i32_26] : memref<8x128xf32, #tpu.memory_space<vmem>> -> memref<1x128xf32, #tpu.memory_space<vmem>>
    %43 = tpu.memref_slice %arg12[%c3_i32] : memref<8x!tpu.dma_semaphore, #tpu.memory_space<semaphore_mem>> -> memref<1x!tpu.dma_semaphore, #tpu.memory_space<semaphore_mem>>
    %44 = tpu.memref_squeeze %43 : memref<1x!tpu.dma_semaphore, #tpu.memory_space<semaphore_mem>> -> memref<!tpu.dma_semaphore, #tpu.memory_space<semaphore_mem>>
    tpu.enqueue_dma source(%41 : memref<1x128xf32, #tpu.memory_space<any>>) target(%42 : memref<1x128xf32, #tpu.memory_space<vmem>>) target_semaphore(%44 : memref<!tpu.dma_semaphore, #tpu.memory_space<semaphore_mem>>)
    %c2_i32_27 = arith.constant 2 : i32
    %45 = arith.addi %3, %c2_i32_27 : i32
    %c2_i32_28 = arith.constant 2 : i32
    %46 = arith.muli %45, %c2_i32_28 : i32
    %47 = arith.addi %46, %4 : i32
    %c0_i32_29 = arith.constant 0 : i32
    %48 = arith.addi %47, %c0_i32_29 : i32
    %49 = arith.index_cast %48 : i32 to index
    %50 = memref.load %arg2[%49] : memref<16xi32, #tpu.memory_space<smem>>
    %c4_i32_30 = arith.constant 4 : i32
    %c0_i32_31 = arith.constant 0 : i32
    %51 = tpu.memref_slice %arg3[%50, %c0_i32_31] : memref<16x128xf32, #tpu.memory_space<any>> -> memref<1x128xf32, #tpu.memory_space<any>>
    %c4_i32_32 = arith.constant 4 : i32
    %c0_i32_33 = arith.constant 0 : i32
    %52 = tpu.memref_slice %arg11[%c4_i32_32, %c0_i32_33] : memref<8x128xf32, #tpu.memory_space<vmem>> -> memref<1x128xf32, #tpu.memory_space<vmem>>
    %53 = tpu.memref_slice %arg12[%c4_i32_30] : memref<8x!tpu.dma_semaphore, #tpu.memory_space<semaphore_mem>> -> memref<1x!tpu.dma_semaphore, #tpu.memory_space<semaphore_mem>>
    %54 = tpu.memref_squeeze %53 : memref<1x!tpu.dma_semaphore, #tpu.memory_space<semaphore_mem>> -> memref<!tpu.dma_semaphore, #tpu.memory_space<semaphore_mem>>
    tpu.enqueue_dma source(%51 : memref<1x128xf32, #tpu.memory_space<any>>) target(%52 : memref<1x128xf32, #tpu.memory_space<vmem>>) target_semaphore(%54 : memref<!tpu.dma_semaphore, #tpu.memory_space<semaphore_mem>>)
    %c2_i32_34 = arith.constant 2 : i32
    %55 = arith.addi %3, %c2_i32_34 : i32
    %c2_i32_35 = arith.constant 2 : i32
    %56 = arith.muli %55, %c2_i32_35 : i32
    %57 = arith.addi %56, %4 : i32
    %c1_i32_36 = arith.constant 1 : i32
    %58 = arith.addi %57, %c1_i32_36 : i32
    %59 = arith.index_cast %58 : i32 to index
    %60 = memref.load %arg2[%59] : memref<16xi32, #tpu.memory_space<smem>>
    %c5_i32 = arith.constant 5 : i32
    %c0_i32_37 = arith.constant 0 : i32
    %61 = tpu.memref_slice %arg3[%60, %c0_i32_37] : memref<16x128xf32, #tpu.memory_space<any>> -> memref<1x128xf32, #tpu.memory_space<any>>
    %c5_i32_38 = arith.constant 5 : i32
    %c0_i32_39 = arith.constant 0 : i32
    %62 = tpu.memref_slice %arg11[%c5_i32_38, %c0_i32_39] : memref<8x128xf32, #tpu.memory_space<vmem>> -> memref<1x128xf32, #tpu.memory_space<vmem>>
    %63 = tpu.memref_slice %arg12[%c5_i32] : memref<8x!tpu.dma_semaphore, #tpu.memory_space<semaphore_mem>> -> memref<1x!tpu.dma_semaphore, #tpu.memory_space<semaphore_mem>>
    %64 = tpu.memref_squeeze %63 : memref<1x!tpu.dma_semaphore, #tpu.memory_space<semaphore_mem>> -> memref<!tpu.dma_semaphore, #tpu.memory_space<semaphore_mem>>
    tpu.enqueue_dma source(%61 : memref<1x128xf32, #tpu.memory_space<any>>) target(%62 : memref<1x128xf32, #tpu.memory_space<vmem>>) target_semaphore(%64 : memref<!tpu.dma_semaphore, #tpu.memory_space<semaphore_mem>>)
    %c3_i32_40 = arith.constant 3 : i32
    %65 = arith.addi %3, %c3_i32_40 : i32
    %c2_i32_41 = arith.constant 2 : i32
    %66 = arith.muli %65, %c2_i32_41 : i32
    %67 = arith.addi %66, %4 : i32
    %c0_i32_42 = arith.constant 0 : i32
    %68 = arith.addi %67, %c0_i32_42 : i32
    %69 = arith.index_cast %68 : i32 to index
    %70 = memref.load %arg2[%69] : memref<16xi32, #tpu.memory_space<smem>>
    %c6_i32 = arith.constant 6 : i32
    %c0_i32_43 = arith.constant 0 : i32
    %71 = tpu.memref_slice %arg3[%70, %c0_i32_43] : memref<16x128xf32, #tpu.memory_space<any>> -> memref<1x128xf32, #tpu.memory_space<any>>
    %c6_i32_44 = arith.constant 6 : i32
    %c0_i32_45 = arith.constant 0 : i32
    %72 = tpu.memref_slice %arg11[%c6_i32_44, %c0_i32_45] : memref<8x128xf32, #tpu.memory_space<vmem>> -> memref<1x128xf32, #tpu.memory_space<vmem>>
    %73 = tpu.memref_slice %arg12[%c6_i32] : memref<8x!tpu.dma_semaphore, #tpu.memory_space<semaphore_mem>> -> memref<1x!tpu.dma_semaphore, #tpu.memory_space<semaphore_mem>>
    %74 = tpu.memref_squeeze %73 : memref<1x!tpu.dma_semaphore, #tpu.memory_space<semaphore_mem>> -> memref<!tpu.dma_semaphore, #tpu.memory_space<semaphore_mem>>
    tpu.enqueue_dma source(%71 : memref<1x128xf32, #tpu.memory_space<any>>) target(%72 : memref<1x128xf32, #tpu.memory_space<vmem>>) target_semaphore(%74 : memref<!tpu.dma_semaphore, #tpu.memory_space<semaphore_mem>>)
    %c3_i32_46 = arith.constant 3 : i32
    %75 = arith.addi %3, %c3_i32_46 : i32
    %c2_i32_47 = arith.constant 2 : i32
    %76 = arith.muli %75, %c2_i32_47 : i32
    %77 = arith.addi %76, %4 : i32
    %c1_i32_48 = arith.constant 1 : i32
    %78 = arith.addi %77, %c1_i32_48 : i32
    %79 = arith.index_cast %78 : i32 to index
    %80 = memref.load %arg2[%79] : memref<16xi32, #tpu.memory_space<smem>>
    %c7_i32 = arith.constant 7 : i32
    %c0_i32_49 = arith.constant 0 : i32
    %81 = tpu.memref_slice %arg3[%80, %c0_i32_49] : memref<16x128xf32, #tpu.memory_space<any>> -> memref<1x128xf32, #tpu.memory_space<any>>
    %c7_i32_50 = arith.constant 7 : i32
    %c0_i32_51 = arith.constant 0 : i32
    %82 = tpu.memref_slice %arg11[%c7_i32_50, %c0_i32_51] : memref<8x128xf32, #tpu.memory_space<vmem>> -> memref<1x128xf32, #tpu.memory_space<vmem>>
    %83 = tpu.memref_slice %arg12[%c7_i32] : memref<8x!tpu.dma_semaphore, #tpu.memory_space<semaphore_mem>> -> memref<1x!tpu.dma_semaphore, #tpu.memory_space<semaphore_mem>>
    %84 = tpu.memref_squeeze %83 : memref<1x!tpu.dma_semaphore, #tpu.memory_space<semaphore_mem>> -> memref<!tpu.dma_semaphore, #tpu.memory_space<semaphore_mem>>
    tpu.enqueue_dma source(%81 : memref<1x128xf32, #tpu.memory_space<any>>) target(%82 : memref<1x128xf32, #tpu.memory_space<vmem>>) target_semaphore(%84 : memref<!tpu.dma_semaphore, #tpu.memory_space<semaphore_mem>>)
    %c0_i32_52 = arith.constant 0 : i32
    %c0_i32_53 = arith.constant 0 : i32
    %85 = tpu.memref_slice %arg3[%10, %c0_i32_53] : memref<16x128xf32, #tpu.memory_space<any>> -> memref<1x128xf32, #tpu.memory_space<any>>
    %c0_i32_54 = arith.constant 0 : i32
    %c0_i32_55 = arith.constant 0 : i32
    %86 = tpu.memref_slice %arg11[%c0_i32_54, %c0_i32_55] : memref<8x128xf32, #tpu.memory_space<vmem>> -> memref<1x128xf32, #tpu.memory_space<vmem>>
    %87 = tpu.memref_slice %arg12[%c0_i32_52] : memref<8x!tpu.dma_semaphore, #tpu.memory_space<semaphore_mem>> -> memref<1x!tpu.dma_semaphore, #tpu.memory_space<semaphore_mem>>
    %88 = tpu.memref_squeeze %87 : memref<1x!tpu.dma_semaphore, #tpu.memory_space<semaphore_mem>> -> memref<!tpu.dma_semaphore, #tpu.memory_space<semaphore_mem>>
    tpu.wait_dma2 semaphore(%88 : memref<!tpu.dma_semaphore, #tpu.memory_space<semaphore_mem>>) src(%85 : memref<1x128xf32, #tpu.memory_space<any>>) dst(%86 : memref<1x128xf32, #tpu.memory_space<vmem>>)
    %c1_i32_56 = arith.constant 1 : i32
    %c0_i32_57 = arith.constant 0 : i32
    %89 = tpu.memref_slice %arg3[%20, %c0_i32_57] : memref<16x128xf32, #tpu.memory_space<any>> -> memref<1x128xf32, #tpu.memory_space<any>>
    %c1_i32_58 = arith.constant 1 : i32
    %c0_i32_59 = arith.constant 0 : i32
    %90 = tpu.memref_slice %arg11[%c1_i32_58, %c0_i32_59] : memref<8x128xf32, #tpu.memory_space<vmem>> -> memref<1x128xf32, #tpu.memory_space<vmem>>
    %91 = tpu.memref_slice %arg12[%c1_i32_56] : memref<8x!tpu.dma_semaphore, #tpu.memory_space<semaphore_mem>> -> memref<1x!tpu.dma_semaphore, #tpu.memory_space<semaphore_mem>>
    %92 = tpu.memref_squeeze %91 : memref<1x!tpu.dma_semaphore, #tpu.memory_space<semaphore_mem>> -> memref<!tpu.dma_semaphore, #tpu.memory_space<semaphore_mem>>
    tpu.wait_dma2 semaphore(%92 : memref<!tpu.dma_semaphore, #tpu.memory_space<semaphore_mem>>) src(%89 : memref<1x128xf32, #tpu.memory_space<any>>) dst(%90 : memref<1x128xf32, #tpu.memory_space<vmem>>)
    %c2_i32_60 = arith.constant 2 : i32
    %c0_i32_61 = arith.constant 0 : i32
    %93 = tpu.memref_slice %arg3[%30, %c0_i32_61] : memref<16x128xf32, #tpu.memory_space<any>> -> memref<1x128xf32, #tpu.memory_space<any>>
    %c2_i32_62 = arith.constant 2 : i32
    %c0_i32_63 = arith.constant 0 : i32
    %94 = tpu.memref_slice %arg11[%c2_i32_62, %c0_i32_63] : memref<8x128xf32, #tpu.memory_space<vmem>> -> memref<1x128xf32, #tpu.memory_space<vmem>>
    %95 = tpu.memref_slice %arg12[%c2_i32_60] : memref<8x!tpu.dma_semaphore, #tpu.memory_space<semaphore_mem>> -> memref<1x!tpu.dma_semaphore, #tpu.memory_space<semaphore_mem>>
    %96 = tpu.memref_squeeze %95 : memref<1x!tpu.dma_semaphore, #tpu.memory_space<semaphore_mem>> -> memref<!tpu.dma_semaphore, #tpu.memory_space<semaphore_mem>>
    tpu.wait_dma2 semaphore(%96 : memref<!tpu.dma_semaphore, #tpu.memory_space<semaphore_mem>>) src(%93 : memref<1x128xf32, #tpu.memory_space<any>>) dst(%94 : memref<1x128xf32, #tpu.memory_space<vmem>>)
    %c3_i32_64 = arith.constant 3 : i32
    %c0_i32_65 = arith.constant 0 : i32
    %97 = tpu.memref_slice %arg3[%40, %c0_i32_65] : memref<16x128xf32, #tpu.memory_space<any>> -> memref<1x128xf32, #tpu.memory_space<any>>
    %c3_i32_66 = arith.constant 3 : i32
    %c0_i32_67 = arith.constant 0 : i32
    %98 = tpu.memref_slice %arg11[%c3_i32_66, %c0_i32_67] : memref<8x128xf32, #tpu.memory_space<vmem>> -> memref<1x128xf32, #tpu.memory_space<vmem>>
    %99 = tpu.memref_slice %arg12[%c3_i32_64] : memref<8x!tpu.dma_semaphore, #tpu.memory_space<semaphore_mem>> -> memref<1x!tpu.dma_semaphore, #tpu.memory_space<semaphore_mem>>
    %100 = tpu.memref_squeeze %99 : memref<1x!tpu.dma_semaphore, #tpu.memory_space<semaphore_mem>> -> memref<!tpu.dma_semaphore, #tpu.memory_space<semaphore_mem>>
    tpu.wait_dma2 semaphore(%100 : memref<!tpu.dma_semaphore, #tpu.memory_space<semaphore_mem>>) src(%97 : memref<1x128xf32, #tpu.memory_space<any>>) dst(%98 : memref<1x128xf32, #tpu.memory_space<vmem>>)
    %c4_i32_68 = arith.constant 4 : i32
    %c0_i32_69 = arith.constant 0 : i32
    %101 = tpu.memref_slice %arg3[%50, %c0_i32_69] : memref<16x128xf32, #tpu.memory_space<any>> -> memref<1x128xf32, #tpu.memory_space<any>>
    %c4_i32_70 = arith.constant 4 : i32
    %c0_i32_71 = arith.constant 0 : i32
    %102 = tpu.memref_slice %arg11[%c4_i32_70, %c0_i32_71] : memref<8x128xf32, #tpu.memory_space<vmem>> -> memref<1x128xf32, #tpu.memory_space<vmem>>
    %103 = tpu.memref_slice %arg12[%c4_i32_68] : memref<8x!tpu.dma_semaphore, #tpu.memory_space<semaphore_mem>> -> memref<1x!tpu.dma_semaphore, #tpu.memory_space<semaphore_mem>>
    %104 = tpu.memref_squeeze %103 : memref<1x!tpu.dma_semaphore, #tpu.memory_space<semaphore_mem>> -> memref<!tpu.dma_semaphore, #tpu.memory_space<semaphore_mem>>
    tpu.wait_dma2 semaphore(%104 : memref<!tpu.dma_semaphore, #tpu.memory_space<semaphore_mem>>) src(%101 : memref<1x128xf32, #tpu.memory_space<any>>) dst(%102 : memref<1x128xf32, #tpu.memory_space<vmem>>)
    %c5_i32_72 = arith.constant 5 : i32
    %c0_i32_73 = arith.constant 0 : i32
    %105 = tpu.memref_slice %arg3[%60, %c0_i32_73] : memref<16x128xf32, #tpu.memory_space<any>> -> memref<1x128xf32, #tpu.memory_space<any>>
    %c5_i32_74 = arith.constant 5 : i32
    %c0_i32_75 = arith.constant 0 : i32
    %106 = tpu.memref_slice %arg11[%c5_i32_74, %c0_i32_75] : memref<8x128xf32, #tpu.memory_space<vmem>> -> memref<1x128xf32, #tpu.memory_space<vmem>>
    %107 = tpu.memref_slice %arg12[%c5_i32_72] : memref<8x!tpu.dma_semaphore, #tpu.memory_space<semaphore_mem>> -> memref<1x!tpu.dma_semaphore, #tpu.memory_space<semaphore_mem>>
    %108 = tpu.memref_squeeze %107 : memref<1x!tpu.dma_semaphore, #tpu.memory_space<semaphore_mem>> -> memref<!tpu.dma_semaphore, #tpu.memory_space<semaphore_mem>>
    tpu.wait_dma2 semaphore(%108 : memref<!tpu.dma_semaphore, #tpu.memory_space<semaphore_mem>>) src(%105 : memref<1x128xf32, #tpu.memory_space<any>>) dst(%106 : memref<1x128xf32, #tpu.memory_space<vmem>>)
    %c6_i32_76 = arith.constant 6 : i32
    %c0_i32_77 = arith.constant 0 : i32
    %109 = tpu.memref_slice %arg3[%70, %c0_i32_77] : memref<16x128xf32, #tpu.memory_space<any>> -> memref<1x128xf32, #tpu.memory_space<any>>
    %c6_i32_78 = arith.constant 6 : i32
    %c0_i32_79 = arith.constant 0 : i32
    %110 = tpu.memref_slice %arg11[%c6_i32_78, %c0_i32_79] : memref<8x128xf32, #tpu.memory_space<vmem>> -> memref<1x128xf32, #tpu.memory_space<vmem>>
    %111 = tpu.memref_slice %arg12[%c6_i32_76] : memref<8x!tpu.dma_semaphore, #tpu.memory_space<semaphore_mem>> -> memref<1x!tpu.dma_semaphore, #tpu.memory_space<semaphore_mem>>
    %112 = tpu.memref_squeeze %111 : memref<1x!tpu.dma_semaphore, #tpu.memory_space<semaphore_mem>> -> memref<!tpu.dma_semaphore, #tpu.memory_space<semaphore_mem>>
    tpu.wait_dma2 semaphore(%112 : memref<!tpu.dma_semaphore, #tpu.memory_space<semaphore_mem>>) src(%109 : memref<1x128xf32, #tpu.memory_space<any>>) dst(%110 : memref<1x128xf32, #tpu.memory_space<vmem>>)
    %c7_i32_80 = arith.constant 7 : i32
    %c0_i32_81 = arith.constant 0 : i32
    %113 = tpu.memref_slice %arg3[%80, %c0_i32_81] : memref<16x128xf32, #tpu.memory_space<any>> -> memref<1x128xf32, #tpu.memory_space<any>>
    %c7_i32_82 = arith.constant 7 : i32
    %c0_i32_83 = arith.constant 0 : i32
    %114 = tpu.memref_slice %arg11[%c7_i32_82, %c0_i32_83] : memref<8x128xf32, #tpu.memory_space<vmem>> -> memref<1x128xf32, #tpu.memory_space<vmem>>
    %115 = tpu.memref_slice %arg12[%c7_i32_80] : memref<8x!tpu.dma_semaphore, #tpu.memory_space<semaphore_mem>> -> memref<1x!tpu.dma_semaphore, #tpu.memory_space<semaphore_mem>>
    %116 = tpu.memref_squeeze %115 : memref<1x!tpu.dma_semaphore, #tpu.memory_space<semaphore_mem>> -> memref<!tpu.dma_semaphore, #tpu.memory_space<semaphore_mem>>
    tpu.wait_dma2 semaphore(%116 : memref<!tpu.dma_semaphore, #tpu.memory_space<semaphore_mem>>) src(%113 : memref<1x128xf32, #tpu.memory_space<any>>) dst(%114 : memref<1x128xf32, #tpu.memory_space<vmem>>)
    %c0 = arith.constant 0 : index
    %c0_84 = arith.constant 0 : index
    %117 = vector.load %arg11[%c0, %c0_84] : memref<8x128xf32, #tpu.memory_space<vmem>>, vector<8x128xf32>
    %c0_85 = arith.constant 0 : index
    %c0_86 = arith.constant 0 : index
    %118 = vector.load %arg4[%c0_85, %c0_86] : memref<128x384xf32, #tpu.memory_space<vmem>>, vector<128x384xf32>
    %cst = arith.constant dense<0.000000e+00> : vector<8x384xf32>
    %119 = tpu.matmul %117, %118, %cst {dimension_numbers = #tpu.dot_dimension_numbers<[1], [0], [0], [1], [0, 0, 1, 1], [], []>} : vector<8x128xf32>, vector<128x384xf32>, vector<8x384xf32> -> vector<8x384xf32>
    %c0_87 = arith.constant 0 : index
    %c0_88 = arith.constant 0 : index
    %120 = vector.load %arg6[%c0_87, %c0_88] : memref<1x384xf32, #tpu.memory_space<vmem>>, vector<1x384xf32>
    %121 = vector.broadcast %120 : vector<1x384xf32> to vector<8x384xf32>
    %122 = arith.addf %119, %121 : vector<8x384xf32>
    %c0_89 = arith.constant 0 : index
    %c0_90 = arith.constant 0 : index
    %123 = vector.load %arg5[%c0_89, %c0_90] : memref<128x384xf32, #tpu.memory_space<vmem>>, vector<128x384xf32>
    %c0_91 = arith.constant 0 : index
    %c0_92 = arith.constant 0 : index
    %124 = vector.load %arg7[%c0_91, %c0_92] : memref<1x128xf32, #tpu.memory_space<vmem>>, vector<1x128xf32>
    %c0_93 = arith.constant 0 : index
    %c0_94 = arith.constant 0 : index
    %125 = vector.load %arg10[%c0_93, %c0_94] : memref<2x128xf32, #tpu.memory_space<vmem>>, vector<2x128xf32>
    %126 = vector.extract_strided_slice %122 {offsets = [0, 0], sizes = [2, 384], strides = [1, 1]} : vector<8x384xf32> to vector<2x384xf32>
    %cst_95 = arith.constant dense<0.000000e+00> : vector<2x384xf32>
    %127 = tpu.matmul %125, %123, %cst_95 {dimension_numbers = #tpu.dot_dimension_numbers<[1], [0], [0], [1], [0, 0, 1, 1], [], []>} : vector<2x128xf32>, vector<128x384xf32>, vector<2x384xf32> -> vector<2x384xf32>
    %128 = vector.extract_strided_slice %126 {offsets = [0, 0], sizes = [2, 128], strides = [1, 1]} : vector<2x384xf32> to vector<2x128xf32>
    %129 = vector.extract_strided_slice %127 {offsets = [0, 0], sizes = [2, 128], strides = [1, 1]} : vector<2x384xf32> to vector<2x128xf32>
    %130 = arith.addf %128, %129 : vector<2x128xf32>
    %cst_96 = arith.constant 5.000000e-01 : f32
    %131 = vector.broadcast %cst_96 : f32 to vector<2x128xf32>
    %132 = arith.mulf %131, %130 : vector<2x128xf32>
    %133 = math.tanh %132 : vector<2x128xf32>
    %cst_97 = arith.constant 1.000000e+00 : f32
    %134 = vector.broadcast %cst_97 : f32 to vector<2x128xf32>
    %135 = arith.addf %133, %134 : vector<2x128xf32>
    %cst_98 = arith.constant 5.000000e-01 : f32
    %136 = vector.broadcast %cst_98 : f32 to vector<2x128xf32>
    %137 = arith.mulf %136, %135 : vector<2x128xf32>
    %138 = vector.extract_strided_slice %126 {offsets = [0, 128], sizes = [2, 128], strides = [1, 1]} : vector<2x384xf32> to vector<2x128xf32>
    %139 = vector.extract_strided_slice %127 {offsets = [0, 128], sizes = [2, 128], strides = [1, 1]} : vector<2x384xf32> to vector<2x128xf32>
    %140 = arith.addf %138, %139 : vector<2x128xf32>
    %cst_99 = arith.constant 5.000000e-01 : f32
    %141 = vector.broadcast %cst_99 : f32 to vector<2x128xf32>
    %142 = arith.mulf %141, %140 : vector<2x128xf32>
    %143 = math.tanh %142 : vector<2x128xf32>
    %cst_100 = arith.constant 1.000000e+00 : f32
    %144 = vector.broadcast %cst_100 : f32 to vector<2x128xf32>
    %145 = arith.addf %143, %144 : vector<2x128xf32>
    %cst_101 = arith.constant 5.000000e-01 : f32
    %146 = vector.broadcast %cst_101 : f32 to vector<2x128xf32>
    %147 = arith.mulf %146, %145 : vector<2x128xf32>
    %148 = vector.extract_strided_slice %126 {offsets = [0, 256], sizes = [2, 128], strides = [1, 1]} : vector<2x384xf32> to vector<2x128xf32>
    %149 = vector.extract_strided_slice %127 {offsets = [0, 256], sizes = [2, 128], strides = [1, 1]} : vector<2x384xf32> to vector<2x128xf32>
    %150 = vector.broadcast %124 : vector<1x128xf32> to vector<2x128xf32>
    %151 = arith.addf %149, %150 : vector<2x128xf32>
    %152 = arith.mulf %137, %151 : vector<2x128xf32>
    %153 = arith.addf %148, %152 : vector<2x128xf32>
    %154 = math.tanh %153 : vector<2x128xf32>
    %cst_102 = arith.constant 1.000000e+00 : f32
    %155 = vector.broadcast %cst_102 : f32 to vector<2x128xf32>
    %156 = arith.subf %155, %147 : vector<2x128xf32>
    %157 = arith.mulf %156, %154 : vector<2x128xf32>
    %158 = arith.mulf %147, %125 : vector<2x128xf32>
    %159 = arith.addf %157, %158 : vector<2x128xf32>
    %160 = vector.extract_strided_slice %122 {offsets = [2, 0], sizes = [2, 384], strides = [1, 1]} : vector<8x384xf32> to vector<2x384xf32>
    %cst_103 = arith.constant dense<0.000000e+00> : vector<2x384xf32>
    %161 = tpu.matmul %159, %123, %cst_103 {dimension_numbers = #tpu.dot_dimension_numbers<[1], [0], [0], [1], [0, 0, 1, 1], [], []>} : vector<2x128xf32>, vector<128x384xf32>, vector<2x384xf32> -> vector<2x384xf32>
    %162 = vector.extract_strided_slice %160 {offsets = [0, 0], sizes = [2, 128], strides = [1, 1]} : vector<2x384xf32> to vector<2x128xf32>
    %163 = vector.extract_strided_slice %161 {offsets = [0, 0], sizes = [2, 128], strides = [1, 1]} : vector<2x384xf32> to vector<2x128xf32>
    %164 = arith.addf %162, %163 : vector<2x128xf32>
    %cst_104 = arith.constant 5.000000e-01 : f32
    %165 = vector.broadcast %cst_104 : f32 to vector<2x128xf32>
    %166 = arith.mulf %165, %164 : vector<2x128xf32>
    %167 = math.tanh %166 : vector<2x128xf32>
    %cst_105 = arith.constant 1.000000e+00 : f32
    %168 = vector.broadcast %cst_105 : f32 to vector<2x128xf32>
    %169 = arith.addf %167, %168 : vector<2x128xf32>
    %cst_106 = arith.constant 5.000000e-01 : f32
    %170 = vector.broadcast %cst_106 : f32 to vector<2x128xf32>
    %171 = arith.mulf %170, %169 : vector<2x128xf32>
    %172 = vector.extract_strided_slice %160 {offsets = [0, 128], sizes = [2, 128], strides = [1, 1]} : vector<2x384xf32> to vector<2x128xf32>
    %173 = vector.extract_strided_slice %161 {offsets = [0, 128], sizes = [2, 128], strides = [1, 1]} : vector<2x384xf32> to vector<2x128xf32>
    %174 = arith.addf %172, %173 : vector<2x128xf32>
    %cst_107 = arith.constant 5.000000e-01 : f32
    %175 = vector.broadcast %cst_107 : f32 to vector<2x128xf32>
    %176 = arith.mulf %175, %174 : vector<2x128xf32>
    %177 = math.tanh %176 : vector<2x128xf32>
    %cst_108 = arith.constant 1.000000e+00 : f32
    %178 = vector.broadcast %cst_108 : f32 to vector<2x128xf32>
    %179 = arith.addf %177, %178 : vector<2x128xf32>
    %cst_109 = arith.constant 5.000000e-01 : f32
    %180 = vector.broadcast %cst_109 : f32 to vector<2x128xf32>
    %181 = arith.mulf %180, %179 : vector<2x128xf32>
    %182 = vector.extract_strided_slice %160 {offsets = [0, 256], sizes = [2, 128], strides = [1, 1]} : vector<2x384xf32> to vector<2x128xf32>
    %183 = vector.extract_strided_slice %161 {offsets = [0, 256], sizes = [2, 128], strides = [1, 1]} : vector<2x384xf32> to vector<2x128xf32>
    %184 = vector.broadcast %124 : vector<1x128xf32> to vector<2x128xf32>
    %185 = arith.addf %183, %184 : vector<2x128xf32>
    %186 = arith.mulf %171, %185 : vector<2x128xf32>
    %187 = arith.addf %182, %186 : vector<2x128xf32>
    %188 = math.tanh %187 : vector<2x128xf32>
    %cst_110 = arith.constant 1.000000e+00 : f32
    %189 = vector.broadcast %cst_110 : f32 to vector<2x128xf32>
    %190 = arith.subf %189, %181 : vector<2x128xf32>
    %191 = arith.mulf %190, %188 : vector<2x128xf32>
    %192 = arith.mulf %181, %159 : vector<2x128xf32>
    %193 = arith.addf %191, %192 : vector<2x128xf32>
    %194 = vector.extract_strided_slice %122 {offsets = [4, 0], sizes = [2, 384], strides = [1, 1]} : vector<8x384xf32> to vector<2x384xf32>
    %cst_111 = arith.constant dense<0.000000e+00> : vector<2x384xf32>
    %195 = tpu.matmul %193, %123, %cst_111 {dimension_numbers = #tpu.dot_dimension_numbers<[1], [0], [0], [1], [0, 0, 1, 1], [], []>} : vector<2x128xf32>, vector<128x384xf32>, vector<2x384xf32> -> vector<2x384xf32>
    %196 = vector.extract_strided_slice %194 {offsets = [0, 0], sizes = [2, 128], strides = [1, 1]} : vector<2x384xf32> to vector<2x128xf32>
    %197 = vector.extract_strided_slice %195 {offsets = [0, 0], sizes = [2, 128], strides = [1, 1]} : vector<2x384xf32> to vector<2x128xf32>
    %198 = arith.addf %196, %197 : vector<2x128xf32>
    %cst_112 = arith.constant 5.000000e-01 : f32
    %199 = vector.broadcast %cst_112 : f32 to vector<2x128xf32>
    %200 = arith.mulf %199, %198 : vector<2x128xf32>
    %201 = math.tanh %200 : vector<2x128xf32>
    %cst_113 = arith.constant 1.000000e+00 : f32
    %202 = vector.broadcast %cst_113 : f32 to vector<2x128xf32>
    %203 = arith.addf %201, %202 : vector<2x128xf32>
    %cst_114 = arith.constant 5.000000e-01 : f32
    %204 = vector.broadcast %cst_114 : f32 to vector<2x128xf32>
    %205 = arith.mulf %204, %203 : vector<2x128xf32>
    %206 = vector.extract_strided_slice %194 {offsets = [0, 128], sizes = [2, 128], strides = [1, 1]} : vector<2x384xf32> to vector<2x128xf32>
    %207 = vector.extract_strided_slice %195 {offsets = [0, 128], sizes = [2, 128], strides = [1, 1]} : vector<2x384xf32> to vector<2x128xf32>
    %208 = arith.addf %206, %207 : vector<2x128xf32>
    %cst_115 = arith.constant 5.000000e-01 : f32
    %209 = vector.broadcast %cst_115 : f32 to vector<2x128xf32>
    %210 = arith.mulf %209, %208 : vector<2x128xf32>
    %211 = math.tanh %210 : vector<2x128xf32>
    %cst_116 = arith.constant 1.000000e+00 : f32
    %212 = vector.broadcast %cst_116 : f32 to vector<2x128xf32>
    %213 = arith.addf %211, %212 : vector<2x128xf32>
    %cst_117 = arith.constant 5.000000e-01 : f32
    %214 = vector.broadcast %cst_117 : f32 to vector<2x128xf32>
    %215 = arith.mulf %214, %213 : vector<2x128xf32>
    %216 = vector.extract_strided_slice %194 {offsets = [0, 256], sizes = [2, 128], strides = [1, 1]} : vector<2x384xf32> to vector<2x128xf32>
    %217 = vector.extract_strided_slice %195 {offsets = [0, 256], sizes = [2, 128], strides = [1, 1]} : vector<2x384xf32> to vector<2x128xf32>
    %218 = vector.broadcast %124 : vector<1x128xf32> to vector<2x128xf32>
    %219 = arith.addf %217, %218 : vector<2x128xf32>
    %220 = arith.mulf %205, %219 : vector<2x128xf32>
    %221 = arith.addf %216, %220 : vector<2x128xf32>
    %222 = math.tanh %221 : vector<2x128xf32>
    %cst_118 = arith.constant 1.000000e+00 : f32
    %223 = vector.broadcast %cst_118 : f32 to vector<2x128xf32>
    %224 = arith.subf %223, %215 : vector<2x128xf32>
    %225 = arith.mulf %224, %222 : vector<2x128xf32>
    %226 = arith.mulf %215, %193 : vector<2x128xf32>
    %227 = arith.addf %225, %226 : vector<2x128xf32>
    %228 = vector.extract_strided_slice %122 {offsets = [6, 0], sizes = [2, 384], strides = [1, 1]} : vector<8x384xf32> to vector<2x384xf32>
    %cst_119 = arith.constant dense<0.000000e+00> : vector<2x384xf32>
    %229 = tpu.matmul %227, %123, %cst_119 {dimension_numbers = #tpu.dot_dimension_numbers<[1], [0], [0], [1], [0, 0, 1, 1], [], []>} : vector<2x128xf32>, vector<128x384xf32>, vector<2x384xf32> -> vector<2x384xf32>
    %230 = vector.extract_strided_slice %228 {offsets = [0, 0], sizes = [2, 128], strides = [1, 1]} : vector<2x384xf32> to vector<2x128xf32>
    %231 = vector.extract_strided_slice %229 {offsets = [0, 0], sizes = [2, 128], strides = [1, 1]} : vector<2x384xf32> to vector<2x128xf32>
    %232 = arith.addf %230, %231 : vector<2x128xf32>
    %cst_120 = arith.constant 5.000000e-01 : f32
    %233 = vector.broadcast %cst_120 : f32 to vector<2x128xf32>
    %234 = arith.mulf %233, %232 : vector<2x128xf32>
    %235 = math.tanh %234 : vector<2x128xf32>
    %cst_121 = arith.constant 1.000000e+00 : f32
    %236 = vector.broadcast %cst_121 : f32 to vector<2x128xf32>
    %237 = arith.addf %235, %236 : vector<2x128xf32>
    %cst_122 = arith.constant 5.000000e-01 : f32
    %238 = vector.broadcast %cst_122 : f32 to vector<2x128xf32>
    %239 = arith.mulf %238, %237 : vector<2x128xf32>
    %240 = vector.extract_strided_slice %228 {offsets = [0, 128], sizes = [2, 128], strides = [1, 1]} : vector<2x384xf32> to vector<2x128xf32>
    %241 = vector.extract_strided_slice %229 {offsets = [0, 128], sizes = [2, 128], strides = [1, 1]} : vector<2x384xf32> to vector<2x128xf32>
    %242 = arith.addf %240, %241 : vector<2x128xf32>
    %cst_123 = arith.constant 5.000000e-01 : f32
    %243 = vector.broadcast %cst_123 : f32 to vector<2x128xf32>
    %244 = arith.mulf %243, %242 : vector<2x128xf32>
    %245 = math.tanh %244 : vector<2x128xf32>
    %cst_124 = arith.constant 1.000000e+00 : f32
    %246 = vector.broadcast %cst_124 : f32 to vector<2x128xf32>
    %247 = arith.addf %245, %246 : vector<2x128xf32>
    %cst_125 = arith.constant 5.000000e-01 : f32
    %248 = vector.broadcast %cst_125 : f32 to vector<2x128xf32>
    %249 = arith.mulf %248, %247 : vector<2x128xf32>
    %250 = vector.extract_strided_slice %228 {offsets = [0, 256], sizes = [2, 128], strides = [1, 1]} : vector<2x384xf32> to vector<2x128xf32>
    %251 = vector.extract_strided_slice %229 {offsets = [0, 256], sizes = [2, 128], strides = [1, 1]} : vector<2x384xf32> to vector<2x128xf32>
    %252 = vector.broadcast %124 : vector<1x128xf32> to vector<2x128xf32>
    %253 = arith.addf %251, %252 : vector<2x128xf32>
    %254 = arith.mulf %239, %253 : vector<2x128xf32>
    %255 = arith.addf %250, %254 : vector<2x128xf32>
    %256 = math.tanh %255 : vector<2x128xf32>
    %cst_126 = arith.constant 1.000000e+00 : f32
    %257 = vector.broadcast %cst_126 : f32 to vector<2x128xf32>
    %258 = arith.subf %257, %249 : vector<2x128xf32>
    %259 = arith.mulf %258, %256 : vector<2x128xf32>
    %260 = arith.mulf %249, %227 : vector<2x128xf32>
    %261 = arith.addf %259, %260 : vector<2x128xf32>
    %262 = vector.shape_cast %159 : vector<2x128xf32> to vector<1x2x128xf32>
    %263 = vector.shape_cast %193 : vector<2x128xf32> to vector<1x2x128xf32>
    %264 = vector.shape_cast %227 : vector<2x128xf32> to vector<1x2x128xf32>
    %265 = vector.shape_cast %261 : vector<2x128xf32> to vector<1x2x128xf32>
    %266 = tpu.concatenate %262, %263, %264, %265 in 0 : vector<1x2x128xf32>, vector<1x2x128xf32>, vector<1x2x128xf32>, vector<1x2x128xf32> -> vector<4x2x128xf32>
    %c0_127 = arith.constant 0 : index
    %c0_128 = arith.constant 0 : index
    %c0_129 = arith.constant 0 : index
    %267 = vector.load %arg8[%c0_127, %c0_128, %c0_129] : memref<4x2x128xf32, #tpu.memory_space<vmem>>, vector<4x2x128xf32>
    tpu.vector_store %arg8[%c0_127, %c0_128, %c0_129], %266 {strides = array<i32>} : memref<4x2x128xf32, #tpu.memory_space<vmem>>, vector<4x2x128xf32>,
    %c0_130 = arith.constant 0 : index
    %c0_131 = arith.constant 0 : index
    %268 = vector.load %arg10[%c0_130, %c0_131] : memref<2x128xf32, #tpu.memory_space<vmem>>, vector<2x128xf32>
    tpu.vector_store %arg10[%c0_130, %c0_131], %261 {strides = array<i32>} : memref<2x128xf32, #tpu.memory_space<vmem>>, vector<2x128xf32>,
    %c0_132 = arith.constant 0 : index
    %c0_133 = arith.constant 0 : index
    %269 = vector.load %arg9[%c0_132, %c0_133] : memref<2x128xf32, #tpu.memory_space<vmem>>, vector<2x128xf32>
    tpu.vector_store %arg9[%c0_132, %c0_133], %261 {strides = array<i32>} : memref<2x128xf32, #tpu.memory_space<vmem>>, vector<2x128xf32>,
    return
  }
  func.func @transform_1(%arg0: i32, %arg1: i32, %arg2: memref<16xi32, #tpu.memory_space<smem>>) -> (i32, i32) {
    %c0_i32 = arith.constant 0 : i32
    %c0_i32_0 = arith.constant 0 : i32
    %c0_i32_1 = arith.constant 0 : i32
    return %c0_i32, %c0_i32_0 : i32, i32
  }
  func.func @transform_2(%arg0: i32, %arg1: i32, %arg2: memref<16xi32, #tpu.memory_space<smem>>) -> (i32, i32) {
    %c0_i32 = arith.constant 0 : i32
    %c0_i32_0 = arith.constant 0 : i32
    %c0_i32_1 = arith.constant 0 : i32
    return %c0_i32, %c0_i32_0 : i32, i32
  }
  func.func @transform_3(%arg0: i32, %arg1: i32, %arg2: memref<16xi32, #tpu.memory_space<smem>>) -> (i32, i32) {
    %c0_i32 = arith.constant 0 : i32
    %c0_i32_0 = arith.constant 0 : i32
    %c0_i32_1 = arith.constant 0 : i32
    return %c0_i32, %c0_i32_0 : i32, i32
  }
  func.func @transform_4(%arg0: i32, %arg1: i32, %arg2: memref<16xi32, #tpu.memory_space<smem>>) -> (i32, i32) {
    %c0_i32 = arith.constant 0 : i32
    %c0_i32_0 = arith.constant 0 : i32
    %c0_i32_1 = arith.constant 0 : i32
    return %c0_i32, %c0_i32_0 : i32, i32
  }
  func.func @transform_5(%arg0: i32, %arg1: i32, %arg2: memref<16xi32, #tpu.memory_space<smem>>) -> (i32, i32, i32) {
    %c0_i32 = arith.constant 0 : i32
    %c0_i32_0 = arith.constant 0 : i32
    return %arg1, %arg0, %c0_i32 : i32, i32, i32
  }
  func.func @transform_6(%arg0: i32, %arg1: i32, %arg2: memref<16xi32, #tpu.memory_space<smem>>) -> (i32, i32) {
    %c0_i32 = arith.constant 0 : i32
    %c0_i32_0 = arith.constant 0 : i32
    return %arg0, %c0_i32 : i32, i32
  }
}

</mosaic_0001>

<bundles_post_ra>
// kernel: tpu_custom_call.1
= control target key start
LH: loop header
LB: loop body
LE: loop exit
PB: predicated region body
PF: predicated region fallthrough
CT: control target
= control target key end

     0   :  { %s3335_s0 = inlined_call_operand.hbm [shape: s32[16], index: 0, kind: input, shape index: {}]   ;;  %s3336_s1 = inlined_call_operand.hbm [shape: f32[16,128], index: 1, kind: input, shape index: {}]   ;;  %s3337_s2 = inlined_call_operand.hbm [shape: f32[128,384], index: 2, kind: input, shape index: {}]   ;;  %s3338_s3 = inlined_call_operand.hbm [shape: f32[128,384], index: 3, kind: input, shape index: {}]   ;;  %s3339_s4 = inlined_call_operand.vmem [shape: f32[1,384], index: 4, kind: input, shape index: {}]   ;;  %s3340_s5 = inlined_call_operand.vmem [shape: f32[1,128], index: 5, kind: input, shape index: {}]   ;;  %s3341_s6 = inlined_call_operand.hbm [shape: f32[8,2,128], index: 6, kind: output, shape index: {0}]   ;;  %s3342_s7 = inlined_call_operand.hbm [shape: f32[2,128], index: 7, kind: output, shape index: {1}]  }
   0x1   :  { %3355 = sst [smem:[#allocation52_spill]] %s3337_s2  ;;  %s2278_s26 = scalar_lea.hbm %s3335_s0, 16 }
   0x2   :  { %3356 = sst [smem:[#allocation53_spill]] %s3338_s3  ;;  %p2279_p0 = scmp.ne.s32.totalorder %s3335_s0, %s2278_s26 }
   0x3   :  { %p2282_p1 = scmp.lt.u32.totalorder %s2278_s26, %s3335_s0 }
   0x5   :  { %p2284_p2 = pnand %p2282_p1, %p2279_p0 }
   0x7   :  { %2287 = shalt.err (!%p2284_p2)  }
   0x8   :  { %s2672_s8 = smov [#allocation6]  }
   0x9   :  { %14 = dma.hbm_to_smem %s3335_s0, 16, %s2672_s8, [#allocation5] }
   0xa   :  { %2614 = dma.done.wait [#allocation5], 16 }
   0xb   :  { %2615 = vsyncadd [#allocation5], 4294967280 }
   0xc   :  { %16 = sfence }
   0xd   :  { %17 = vsyncpa [#allocation8], 0 }
   0xe   :  { %18 = vsyncpa [#allocation11], 0 }
   0xf   :  { %19 = vsyncpa [#allocation9], 0 }
  0x10   :  { %21 = vsyncpa [#allocation9 + $0x1], 0 }
  0x11   :  { %22 = vsyncpa [#allocation14], 0  ;;  %s2745_s11 = smov 0   ;;  %s2747_s12 = smov 0  }
  0x12   :  { %s2749_s13 = smov 0   ;;  %s2751_s14 = smov 0  }
  0x13   :  { %s2753_s15 = smov 0   ;;  %s2755_s16 = smov 0  }
  0x14 LB: > { %3357 = sst [smem:[#allocation46_spill]] %s2650_s11  ;;  %s1565_s0 = sadd.s32 4294967295, %s2670_s16   ;;  %s2670_s16 = sphi %s2755_s16, %s28_s16   ;;  %s2666_s15 = sphi %s2753_s15, %s3382_s15   ;;  %s2662_s14 = sphi %s2751_s14, %s3381_s14   ;;  %s2658_s13 = sphi %s2749_s13, %s3380_s13   ;;  %s2654_s12 = sphi %s2747_s12, %s3384_s12   ;;  %s2650_s11 = sphi %s2745_s11, %s3383_s11  }
  0x15   : > { %3358 = sst [smem:[#allocation47_spill]] %s2658_s13  ;;  %s1566_s17 = sadd.s32 4294967294, %s2670_s16  }
  0x16   : > { %3359 = sst [smem:[#allocation48_spill]] %s2666_s15  ;;  %s37_s18 = sadd.s32 1, %s2666_s15 }
  0x17   : > { %s133_s19 = sadd.s32 1, %s2658_s13  ;;  %p38_p3 = scmp.ge.s32.totalorder %s37_s18, 2 }
  0x18   : > { %p143_p4 = scmp.ne.s32.totalorder %s2658_s13, %s2654_s12  ;;  %p2781_p5 = scmp.eq.s32.totalorder %s1565_s0, 1 }
  0x19   : > { %p149_p6 = scmp.ne.s32.totalorder %s2654_s12, %s2650_s11  ;;  %s3386_s18 = smov (%p38_p3, %s37_s18), 0 }
  0x1a   : > { %s3360_s20 = scalar_select %p2781_p5, 1, 0 }
  0x1b   : > { %3361 = sst [smem:[#allocation49_spill]] %s3386_s18  ;;  %p2791_p7 = por %p2781_p5, %p143_p4 }
  0x1c   : > { %p150_p8 = scmp.eq.s32.totalorder %s1566_s17, 1  ;;  %s128_s22 = ssub.s32 %s2666_s15, %s3386_s18 }
  0x1d   : > { %s3362_s21 = scalar_select %p2791_p7, 1, 0 }
  0x1e   : > { %p1567_p9 = scmp.ge.s32.totalorder %s2670_s16, 1  ;;  %p131_p10 = scmp.eq.s32.totalorder %s128_s22, 0 }
  0x1f   : > { %p2798_p11 = por %p150_p8, %p149_p6  ;;  %p183_p12 = scmp.lt.s32.totalorder %s2670_s16, 3 }
  0x20   : > { %s2804_s24 = scalar_select %p131_p10, %s2658_s13, %s133_s19  }
  0x21   : > { %s3363_s23 = scalar_select %p2798_p11, 1, 0 }
  0x22   : > { %3365 = sst [smem:[#allocation51_spill]] %s2804_s24  ;;  %p2806_p13 = pnand %p1567_p9, %p183_p12 }
  0x23   : > { %3364 = sst [smem:[#allocation50_spill]] %s3363_s23  ;;  %p2810_p0 = scmp.eq.s32.totalorder %s1565_s0, 0 }
  0x24   : > { %s3366_s25 = scalar_select %p2806_p13, 1, 0 }
  0x25   : > { %s3367_s26 = scalar_select %p2810_p0, 1, 0 }
  0x26   : > { %p2168_p1 = pneg %p2806_p13  ;;  %s2673_s27 = smov [#allocation7]  }
  0x27   : > { %s195_s28 = sshll.u32 %s2673_s27, 4  ;;  %s2674_s30 = smov [#allocation10]   ;;  %s196_s28 = int_to_ptr.vmem [resolvable:$true] %s195_s28 }
  0x28   : > { %p2818_p2 = pnand %p2810_p0, %p2168_p1  ;;  %s208_s8 = sshll.u32 %s2674_s30, 4  ;;  %s2822_s8 = int_to_ptr.vmem [resolvable:$true] %s208_s8 }
  0x29   : > { %s3369_s2 = sld [smem:[#allocation52_spill]] }
  0x2a   : > { %p2290_p4 = pneg %p2818_p2 }
  0x2f   : > { %s2288_s0 = scalar_lea.hbm %s3369_s2, 6144 }
  0x30   : > { %p2289_p3 = scmp.ne.s32.totalorder %s3369_s2, %s2288_s0  ;;  %p2295_p9 = scmp.lt.u32.totalorder %s2288_s0, %s3369_s2 }
  0x32   : > { %p2291_p6 = pnand %p2290_p4, %p2289_p3 }
  0x34   : > { %p2292_p8 = pneg %p2291_p6 }
  0x36   : > { %p2297_p10 = pnand %p2295_p9, %p2292_p8 }
  0x38   : > { %2300 = shalt.err (!%p2297_p10)
}
  0x39   : > { %s2301_s30 = scalar_lea.vmem %s196_s28, 6144  ;;  %p2309_p7 = scmp.lt.s32.totalorder %s196_s28, %s196_s28 }
  0x3a   : > { %p2302_p12 = scmp.ne.s32.totalorder %s196_s28, %s2301_s30  ;;  %p2310_p5 = scmp.lt.s32.totalorder %s2301_s30, %s2301_s30 }
  0x3c   : > { %p2304_p1 = pnand %p2302_p12, %p2290_p4  ;;  %p2311_p0 = por %p2310_p5, %p2309_p7 }
  0x3e   : > { %p2305_p11 = pneg %p2304_p1 }
  0x40   : > { %p2312_p13 = pnand %p2311_p0, %p2305_p11 }
  0x42   : > { %2315 = shalt.err (!%p2312_p13)
}
  0x43   : > { %s2675_s9 = smov 384   ;;  %s2676_s10 = smov 24  }
  0x44   : > { %2171 = dma.hbm_to_vmem [thread:$0]  (!%p2818_p2), %s3369_s2, 6144, %s196_s28, [#allocation8], %s2675_s9, %s2675_s9, %s2676_s10  }
  0x45   : > { %s3370_s3 = sld [smem:[#allocation53_spill]] }
  0x4b   : > { %s2316_s27 = scalar_lea.hbm %s3370_s3, 6144 }
  0x4c   : > { %p2317_p3 = scmp.ne.s32.totalorder %s3370_s3, %s2316_s27  ;;  %p2323_p11 = scmp.lt.u32.totalorder %s2316_s27, %s3370_s3 }
  0x4e   : > { %p2319_p5 = pnand %p2317_p3, %p2290_p4 }
  0x50   : > { %p2320_p7 = pneg %p2319_p5 }
  0x52   : > { %p2325_p13 = pnand %p2323_p11, %p2320_p7 }
  0x54   : > { %2328 = shalt.err (!%p2325_p13)
}
  0x55   : > { %s2329_s28 = scalar_lea.vmem %s2822_s8, 6144  ;;  %p2337_p9 = scmp.lt.s32.totalorder %s2822_s8, %s2822_s8 }
  0x56   : > { %p2330_p0 = scmp.ne.s32.totalorder %s2822_s8, %s2329_s28  ;;  %p2338_p10 = scmp.lt.s32.totalorder %s2329_s28, %s2329_s28 }
  0x58   : > { %p2332_p6 = pnand %p2330_p0, %p2290_p4  ;;  %p2339_p12 = por %p2338_p10, %p2337_p9 }
  0x5a   : > { %p2333_p8 = pneg %p2332_p6 }
  0x5c   : > { %p2340_p1 = pnand %p2339_p12, %p2333_p8 }
  0x5e   : > { %2343 = shalt.err (!%p2340_p1)
}
  0x5f   : > { %2174 = dma.hbm_to_vmem [thread:$0]  (!%p2818_p2), %s3370_s3, 6144, %s2822_s8, [#allocation11], %s2675_s9, %s2675_s9, %s2676_s10  }
  0x60   : > { %p3371_p3 = scmp.ne.s32.totalorder %s3366_s25, 0 }
  0x61   : > { %p3372_p5 = scmp.ne.s32.totalorder (!%p3371_p3), %s3367_s26, 0 }
  0x62   : > { %230 = sbr.rel (%p3371_p3) target bundleno = 1429 (0x595), region = 36 }
  0x69   : > { %2617 = dma.done.wait (%p3372_p5), [#allocation8], 6144  }
  0x6a   : > { %2619 = vsyncadd (%p3372_p5), [#allocation8], 4294961152 }
  0x6b   : > { %2621 = dma.done.wait (%p3372_p5), [#allocation11], 6144  }
  0x6c   : > { %2623 = vsyncadd (%p3372_p5), [#allocation11], 4294961152  ;;  %s3351_s24 = sand.u32 1, %s2654_s12   ;;  %p1574_p2 = scmp.ne.s32.totalorder %s2662_s14, 0 }
  0x6d   : > { %s1573_s29 = sshll.u32 %s3351_s24, 3  ;;  %v2677_v0 = vmov (!%p1574_p2), 0.0  }
  0x6e   : > { %s2884_s8 = scalar_lea.vmem [#allocation12], %s1573_s29  ;;  %261 = sbr.rel (%p1574_p2) target bundleno = 117 (0x75), region = 48  ;;  %262 = vst [vmem:[#allocation2] sm:$0x3] (!%p1574_p2), %v2677_v0 }
  0x75 PF: > { %s2888_s25 = sshll.u32 %s2662_s14, 3  ;;  %s2678_s9 = smov [#allocation3]  }
  0x76   : > { %s267_s26 = sld [smem:[#allocation6 + %s2888_s25]]  ;;  %s277_s10 = sshll.u32 %s2678_s9, 4  ;;  %s2891_s10 = int_to_ptr.vmem [resolvable:$true] %s277_s10 }
  0x77   : > { %s281_s0 = sadd.s32 1, %s2888_s25  ;;  %s2679_s19 = smov [#allocation3 + $0x1]  }
  0x78   : > { %s2894_s17 = sld [smem:[#allocation6 + %s281_s0]]  ;;  %s294_s22 = sshll.u32 %s2679_s19, 4  ;;  %s2897_s22 = int_to_ptr.vmem [resolvable:$true] %s294_s22 }
  0x79   : > { %s1605_s27 = sadd.s32 2, %s2888_s25  ;;  %s2680_s18 = smov [#allocation3 + $0x2]  }
  0x7a   : > { %s2899_s30 = sld [smem:[#allocation6 + %s1605_s27]]  ;;  %s317_s28 = sadd.s32 1, %s1605_s27 }
  0x7b   : > { %s313_s29 = sshll.u32 %s2680_s18, 4  ;;  %s2909_s19 = scalar_lea.hbm %s3336_s1, 256  ;;  %s2904_s29 = int_to_ptr.vmem [resolvable:$true] %s313_s29 }
  0x7c   : > { %s1577_s15 = sshll.u32 %s267_s26, 4 }
  0x7d   : > { %s269_s9 = scalar_lea.hbm %s3336_s1, %s1577_s15 }
  0x7e   : > { %s2344_s3 = scalar_lea.hbm %s269_s9, 16  ;;  %p2347_p7 = scmp.lt.u32.totalorder %s269_s9, %s3336_s1 }
  0x7f   : > { %p2345_p4 = scmp.ne.s32.totalorder %s269_s9, %s2344_s3  ;;  %p2348_p11 = scmp.lt.u32.totalorder %s2909_s19, %s2344_s3 }
  0x80   : > { %p2350_p0 = scmp.lt.u32.totalorder %s2344_s3, %s269_s9 }
  0x81   : > { %p2349_p13 = por %p2348_p11, %p2347_p7 }
  0x83   : > { %p2351_p6 = por %p2350_p0, %p2349_p13 }
  0x85   : > { %p2352_p8 = pnand %p2351_p6, %p2345_p4 }
  0x87   : > { %2355 = shalt.err (!%p2352_p8)  }
  0x88   : > { %s2356_s2 = scalar_lea.vmem %s2891_s10, 16  ;;  %s2918_s13 = scalar_lea.vmem %s2891_s10, 128 }
  0x89   : > { %p2357_p9 = scmp.ne.s32.totalorder %s2891_s10, %s2356_s2  ;;  %p2361_p10 = scmp.lt.s32.totalorder %s2891_s10, %s2891_s10 }
  0x8a   : > { %p2362_p12 = scmp.lt.s32.totalorder %s2918_s13, %s2356_s2 }
  0x8c   : > { %p2363_p1 = por %p2362_p12, %p2361_p10 }
  0x8e   : > { %p2364_p3 = pnand %p2363_p1, %p2357_p9 }
  0x90   : > { %2367 = shalt.err (!%p2364_p3)  }
  0x91   : > { %280 = dma.hbm_to_vmem [thread:$0]  %s269_s9, 16, %s2891_s10, [#allocation4] }
  0x92   : > { %s1578_s3 = sshll.u32 %s2894_s17, 4  ;;  %s2925_s11 = sld [smem:[#allocation6 + %s317_s28]] }
  0x93   : > { %s284_s26 = scalar_lea.hbm %s3336_s1, %s1578_s3  ;;  %s1580_s27 = sshll.u32 %s2899_s30, 4 }
  0x94   : > { %s2368_s15 = scalar_lea.hbm %s284_s26, 16  ;;  %p2371_p2 = scmp.lt.u32.totalorder %s284_s26, %s3336_s1 }
  0x95   : > { %p2369_p5 = scmp.ne.s32.totalorder %s284_s26, %s2368_s15  ;;  %p2372_p4 = scmp.lt.u32.totalorder %s2909_s19, %s2368_s15 }
  0x96   : > { %p2374_p11 = scmp.lt.u32.totalorder %s2368_s15, %s284_s26 }
  0x97   : > { %p2373_p7 = por %p2372_p4, %p2371_p2 }
  0x99   : > { %p2375_p13 = por %p2374_p11, %p2373_p7 }
  0x9b   : > { %p2376_p0 = pnand %p2375_p13, %p2369_p5 }
  0x9d   : > { %2379 = shalt.err (!%p2376_p0)  }
  0x9e   : > { %s2380_s17 = scalar_lea.vmem %s2897_s22, 16  ;;  %p2385_p8 = scmp.lt.s32.totalorder %s2897_s22, %s2891_s10 }
  0x9f   : > { %p2381_p6 = scmp.ne.s32.totalorder %s2897_s22, %s2380_s17  ;;  %p2386_p9 = scmp.lt.s32.totalorder %s2918_s13, %s2380_s17 }
  0xa1   : > { %p2387_p10 = por %p2386_p9, %p2385_p8 }
  0xa3   : > { %p2388_p12 = pnand %p2387_p10, %p2381_p6 }
  0xa5   : > { %2391 = shalt.err (!%p2388_p12)  }
  0xa6   : > { %297 = dma.hbm_to_vmem [thread:$0]  %s284_s26, 16, %s2897_s22, [#allocation4 + $0x1] }
  0xa7   : > { %s303_s9 = scalar_lea.hbm %s3336_s1, %s1580_s27 }
  0xa8   : > { %s2392_s2 = scalar_lea.hbm %s303_s9, 16  ;;  %p2395_p3 = scmp.lt.u32.totalorder %s303_s9, %s3336_s1 }
  0xa9   : > { %p2393_p1 = scmp.ne.s32.totalorder %s303_s9, %s2392_s2  ;;  %p2396_p5 = scmp.lt.u32.totalorder %s2909_s19, %s2392_s2 }
  0xaa   : > { %p2398_p4 = scmp.lt.u32.totalorder %s2392_s2, %s303_s9 }
  0xab   : > { %p2397_p2 = por %p2396_p5, %p2395_p3 }
  0xad   : > { %p2399_p7 = por %p2398_p4, %p2397_p2 }
  0xaf   : > { %p2400_p11 = pnand %p2399_p7, %p2393_p1 }
  0xb1   : > { %2403 = shalt.err (!%p2400_p11)  }
  0xb2   : > { %s2404_s22 = scalar_lea.vmem %s2904_s29, 16  ;;  %p2409_p0 = scmp.lt.s32.totalorder %s2904_s29, %s2891_s10 }
  0xb3   : > { %p2405_p13 = scmp.ne.s32.totalorder %s2904_s29, %s2404_s22  ;;  %p2410_p6 = scmp.lt.s32.totalorder %s2918_s13, %s2404_s22 }
  0xb5   : > { %p2411_p8 = por %p2410_p6, %p2409_p0 }
  0xb7   : > { %p2412_p9 = pnand %p2411_p8, %p2405_p13 }
  0xb9   : > { %2415 = shalt.err (!%p2412_p9)  }
  0xba   : > { %316 = dma.hbm_to_vmem [thread:$0]  %s303_s9, 16, %s2904_s29, [#allocation4 + $0x2] }
  0xbb   : > { %s2681_s24 = smov [#allocation3 + $0x3]   ;;  %s1607_s27 = sadd.s32 4, %s2888_s25 }
  0xbc   : > { %s330_s26 = sshll.u32 %s2681_s24, 4  ;;  %s1581_s15 = sshll.u32 %s2925_s11, 4  ;;  %s331_s26 = int_to_ptr.vmem [resolvable:$true] %s330_s26 }
  0xbd   : > { %s320_s17 = scalar_lea.hbm %s3336_s1, %s1581_s15  ;;  %s2959_s30 = sld [smem:[#allocation6 + %s1607_s27]] }
  0xbe   : > { %s2416_s28 = scalar_lea.hbm %s320_s17, 16  ;;  %p2419_p12 = scmp.lt.u32.totalorder %s320_s17, %s3336_s1 }
  0xbf   : > { %p2417_p10 = scmp.ne.s32.totalorder %s320_s17, %s2416_s28  ;;  %p2420_p1 = scmp.lt.u32.totalorder %s2909_s19, %s2416_s28 }
  0xc0   : > { %p2422_p5 = scmp.lt.u32.totalorder %s2416_s28, %s320_s17 }
  0xc1   : > { %p2421_p3 = por %p2420_p1, %p2419_p12 }
  0xc3   : > { %p2423_p2 = por %p2422_p5, %p2421_p3 }
  0xc5   : > { %p2424_p4 = pnand %p2423_p2, %p2417_p10 }
  0xc7   : > { %2427 = shalt.err (!%p2424_p4)  }
  0xc8   : > { %s2428_s29 = scalar_lea.vmem %s331_s26, 16  ;;  %p2433_p11 = scmp.lt.s32.totalorder %s331_s26, %s2891_s10 }
  0xc9   : > { %p2429_p7 = scmp.ne.s32.totalorder %s331_s26, %s2428_s29  ;;  %p2434_p13 = scmp.lt.s32.totalorder %s2918_s13, %s2428_s29 }
  0xcb   : > { %p2435_p0 = por %p2434_p13, %p2433_p11 }
  0xcd   : > { %p2436_p6 = pnand %p2435_p0, %p2429_p7 }
  0xcf   : > { %2439 = shalt.err (!%p2436_p6)  }
  0xd0   : > { %333 = dma.hbm_to_vmem [thread:$0]  %s320_s17, 16, %s331_s26, [#allocation4 + $0x3] }
  0xd1   : > { %s353_s11 = sadd.s32 1, %s1607_s27  ;;  %s2682_s9 = smov [#allocation3 + $0x4]  }
  0xd2   : > { %s349_s23 = sshll.u32 %s2682_s9, 4  ;;  %s354_s22 = sld [smem:[#allocation6 + %s353_s11]]  ;;  %s350_s23 = int_to_ptr.vmem [resolvable:$true] %s349_s23 }
  0xd3   : > { %s2683_s24 = smov [#allocation3 + $0x5]   ;;  %s1609_s18 = sadd.s32 6, %s2888_s25 }
  0xd4   : > { %s366_s15 = sshll.u32 %s2683_s24, 4  ;;  %s1583_s0 = sshll.u32 %s2959_s30, 4  ;;  %s2969_s15 = int_to_ptr.vmem [resolvable:$true] %s366_s15 }
  0xd5   : > { %s339_s3 = scalar_lea.hbm %s3336_s1, %s1583_s0  ;;  %s2976_s26 = sld [smem:[#allocation6 + %s1609_s18]] }
  0xd6   : > { %s2440_s17 = scalar_lea.hbm %s339_s3, 16  ;;  %p2443_p9 = scmp.lt.u32.totalorder %s339_s3, %s3336_s1 }
  0xd7   : > { %p2441_p8 = scmp.ne.s32.totalorder %s339_s3, %s2440_s17  ;;  %p2444_p10 = scmp.lt.u32.totalorder %s2909_s19, %s2440_s17 }
  0xd8   : > { %p2446_p1 = scmp.lt.u32.totalorder %s2440_s17, %s339_s3 }
  0xd9   : > { %p2445_p12 = por %p2444_p10, %p2443_p9 }
  0xdb   : > { %p2447_p3 = por %p2446_p1, %p2445_p12 }
  0xdd   : > { %p2448_p5 = pnand %p2447_p3, %p2441_p8 }
  0xdf   : > { %2451 = shalt.err (!%p2448_p5)  }
  0xe0   : > { %s2452_s30 = scalar_lea.vmem %s350_s23, 16  ;;  %p2457_p4 = scmp.lt.s32.totalorder %s350_s23, %s2891_s10 }
  0xe1   : > { %p2453_p2 = scmp.ne.s32.totalorder %s350_s23, %s2452_s30  ;;  %p2458_p7 = scmp.lt.s32.totalorder %s2918_s13, %s2452_s30 }
  0xe3   : > { %p2459_p11 = por %p2458_p7, %p2457_p4 }
  0xe5   : > { %p2460_p13 = pnand %p2459_p11, %p2453_p2 }
  0xe7   : > { %2463 = shalt.err (!%p2460_p13)  }
  0xe8   : > { %352 = dma.hbm_to_vmem [thread:$0]  %s339_s3, 16, %s350_s23, [#allocation4 + $0x4] }
  0xe9   : > { %s1584_s11 = sshll.u32 %s354_s22, 4  ;;  %s2684_s28 = smov [#allocation3 + $0x6]  }
  0xea   : > { %s356_s0 = scalar_lea.hbm %s3336_s1, %s1584_s11  ;;  %s385_s2 = sshll.u32 %s2684_s28, 4  ;;  %s386_s2 = int_to_ptr.vmem [resolvable:$true] %s385_s2 }
  0xeb   : > { %s2464_s17 = scalar_lea.hbm %s356_s0, 16  ;;  %p2467_p6 = scmp.lt.u32.totalorder %s356_s0, %s3336_s1 }
  0xec   : > { %p2465_p0 = scmp.ne.s32.totalorder %s356_s0, %s2464_s17  ;;  %p2468_p8 = scmp.lt.u32.totalorder %s2909_s19, %s2464_s17 }
  0xed   : > { %p2470_p10 = scmp.lt.u32.totalorder %s2464_s17, %s356_s0 }
  0xee   : > { %p2469_p9 = por %p2468_p8, %p2467_p6 }
  0xf0   : > { %p2471_p12 = por %p2470_p10, %p2469_p9 }
  0xf2   : > { %p2472_p1 = pnand %p2471_p12, %p2465_p0 }
  0xf4   : > { %2475 = shalt.err (!%p2472_p1)  }
  0xf5   : > { %s2476_s23 = scalar_lea.vmem %s2969_s15, 16  ;;  %p2481_p5 = scmp.lt.s32.totalorder %s2969_s15, %s2891_s10 }
  0xf6   : > { %p2477_p3 = scmp.ne.s32.totalorder %s2969_s15, %s2476_s23  ;;  %p2482_p2 = scmp.lt.s32.totalorder %s2918_s13, %s2476_s23 }
  0xf8   : > { %p2483_p4 = por %p2482_p2, %p2481_p5 }
  0xfa   : > { %p2484_p7 = pnand %p2483_p4, %p2477_p3 }
  0xfc   : > { %2487 = shalt.err (!%p2484_p7)  }
  0xfd   : > { %369 = dma.hbm_to_vmem [thread:$0]  %s356_s0, 16, %s2969_s15, [#allocation4 + $0x5] }
  0xfe   : > { %s389_s22 = sadd.s32 1, %s1609_s18  ;;  %s1586_s3 = sshll.u32 %s2976_s26, 4 }
  0xff   : > { %s390_s30 = sld [smem:[#allocation6 + %s389_s22]]  ;;  %s375_s24 = scalar_lea.hbm %s3336_s1, %s1586_s3 }
 0x100   : > { %s2488_s28 = scalar_lea.hbm %s375_s24, 16  ;;  %p2491_p13 = scmp.lt.u32.totalorder %s375_s24, %s3336_s1 }
 0x101   : > { %p2489_p11 = scmp.ne.s32.totalorder %s375_s24, %s2488_s28  ;;  %p2492_p0 = scmp.lt.u32.totalorder %s2909_s19, %s2488_s28 }
 0x102   : > { %p2494_p8 = scmp.lt.u32.totalorder %s2488_s28, %s375_s24 }
 0x103   : > { %p2493_p6 = por %p2492_p0, %p2491_p13 }
 0x105   : > { %p2495_p9 = por %p2494_p8, %p2493_p6 }
 0x107   : > { %p2496_p10 = pnand %p2495_p9, %p2489_p11 }
 0x109   : > { %2499 = shalt.err (!%p2496_p10)  }
 0x10a   : > { %s2500_s25 = scalar_lea.vmem %s386_s2, 16  ;;  %p2505_p1 = scmp.lt.s32.totalorder %s386_s2, %s2891_s10 }
 0x10b   : > { %p2501_p12 = scmp.ne.s32.totalorder %s386_s2, %s2500_s25  ;;  %p2506_p3 = scmp.lt.s32.totalorder %s2918_s13, %s2500_s25 }
 0x10d   : > { %p2507_p5 = por %p2506_p3, %p2505_p1 }
 0x10f   : > { %p2508_p2 = pnand %p2507_p5, %p2501_p12 }
 0x111   : > { %2511 = shalt.err (!%p2508_p2)  }
 0x112   : > { %388 = dma.hbm_to_vmem [thread:$0]  %s375_s24, 16, %s386_s2, [#allocation4 + $0x6] }
 0x113   : > { %s2685_s15 = smov [#allocation3 + $0x7]   ;;  %s1587_s26 = sshll.u32 %s390_s30, 4 }
 0x114   : > { %s402_s18 = sshll.u32 %s2685_s15, 4  ;;  %s392_s23 = scalar_lea.hbm %s3336_s1, %s1587_s26  ;;  %s403_s18 = int_to_ptr.vmem [resolvable:$true] %s402_s18 }
 0x115   : > { %s2512_s22 = scalar_lea.hbm %s392_s23, 16  ;;  %p2515_p7 = scmp.lt.u32.totalorder %s392_s23, %s3336_s1 }
 0x116   : > { %p2513_p4 = scmp.ne.s32.totalorder %s392_s23, %s2512_s22  ;;  %p2516_p11 = scmp.lt.u32.totalorder %s2909_s19, %s2512_s22 }
 0x117   : > { %p2518_p0 = scmp.lt.u32.totalorder %s2512_s22, %s392_s23 }
 0x118   : > { %p2517_p13 = por %p2516_p11, %p2515_p7 }
 0x11a   : > { %p2519_p6 = por %p2518_p0, %p2517_p13 }
 0x11c   : > { %p2520_p8 = pnand %p2519_p6, %p2513_p4 }
 0x11e   : > { %2523 = shalt.err (!%p2520_p8)  }
 0x11f   : > { %s2524_s2 = scalar_lea.vmem %s403_s18, 16  ;;  %p2529_p10 = scmp.lt.s32.totalorder %s403_s18, %s2891_s10 }
 0x120   : > { %p2525_p9 = scmp.ne.s32.totalorder %s403_s18, %s2524_s2  ;;  %p2530_p12 = scmp.lt.s32.totalorder %s2918_s13, %s2524_s2 }
 0x122   : > { %p2531_p1 = por %p2530_p12, %p2529_p10 }
 0x124   : > { %p2532_p3 = pnand %p2531_p1, %p2525_p9 }
 0x126   : > { %2535 = shalt.err (!%p2532_p3)  }
 0x127   : > { %405 = dma.hbm_to_vmem [thread:$0]  %s392_s23, 16, %s403_s18, [#allocation4 + $0x7] }
 0x128   : > { %2624 = dma.done.wait [#allocation4], 16 }
 0x129   : > { %2625 = vsyncadd [#allocation4], 4294967280 }
 0x12a   : > { %2626 = dma.done.wait [#allocation4 + $0x1], 16 }
 0x12b   : > { %2627 = vsyncadd [#allocation4 + $0x1], 4294967280 }
 0x12c   : > { %2628 = dma.done.wait [#allocation4 + $0x2], 16 }
 0x12d   : > { %2629 = vsyncadd [#allocation4 + $0x2], 4294967280 }
 0x12e   : > { %2630 = dma.done.wait [#allocation4 + $0x3], 16 }
 0x12f   : > { %2631 = vsyncadd [#allocation4 + $0x3], 4294967280 }
 0x130   : > { %2632 = dma.done.wait [#allocation4 + $0x4], 16 }
 0x131   : > { %2633 = vsyncadd [#allocation4 + $0x4], 4294967280 }
 0x132   : > { %2634 = dma.done.wait [#allocation4 + $0x5], 16 }
 0x133   : > { %2635 = vsyncadd [#allocation4 + $0x5], 4294967280 }
 0x134   : > { %2636 = dma.done.wait [#allocation4 + $0x6], 16 }
 0x135   : > { %2637 = vsyncadd [#allocation4 + $0x6], 4294967280 }
 0x136   : > { %2638 = dma.done.wait [#allocation4 + $0x7], 16 }
 0x137   : > { %2639 = vsyncadd [#allocation4 + $0x7], 4294967280  ;;  %v2686_v1 = vmov 0.0|0.0   ;;  %v2687_v2 = vmov 0.0   ;;  %vm2688_vm0 = vmmov 0   ;;  %v425_v3 = vld [vmem:[#allocation7 + $0x8] sm:$0xff] }
 0x138   : > { %1906 = vmatprep.subr.bf16.mxu1 %v2686_v1  ;;  %553 = vmatprep.mubr.f32.mxu0 %v2687_v2  ;;  %v428_v4 = vld [vmem:[#allocation7 + $0x20] sm:$0xff]  ;;  %v427_v7 = vld [vmem:[#allocation7 + $0x18] sm:$0xff]  ;;  %v434_v9 = vld [vmem:[#allocation7 + $0x50] sm:$0xff]  ;;  %s2689_s9 = smov [#allocation13]   ;;  %s1610_s28 = sshll.u32 %s2662_s14, 7 }
 0x139   : > { %1731 = vmatprep.mubr.msk.f32.mxu1 %vm2688_vm0, %v2687_v2  ;;  %v424_v5 = vld [vmem:[#allocation7] sm:$0xff]  ;;  %v1874_v6 = vpack.c.bf16 %v428_v4, %v425_v3  ;;  %v431_v8 = vld [vmem:[#allocation7 + $0x38] sm:$0xff]  ;;  %v430_v12 = vld [vmem:[#allocation7 + $0x30] sm:$0xff]  ;;  %s1402_s24 = sshll.u32 %s2689_s9, 4  ;;  %s1386_s17 = sshll.u32 %s2884_s8, 4  ;;  %s1403_s24 = int_to_ptr.vmem [resolvable:$true] %s1402_s24  ;;  %s3262_s17 = int_to_ptr.vmem [resolvable:$true] %s1386_s17 }
 0x13a   : > { %v1876_v10 = vpack.c.bf16 %v427_v7, %v424_v5  ;;  %v1878_v11 = vpack.c.bf16 %v434_v9, %v431_v8  ;;  %v433_v13 = vld [vmem:[#allocation7 + $0x48] sm:$0xff]  ;;  %v440_v15 = vld [vmem:[#allocation7 + $0x80] sm:$0xff]  ;;  %v439_v19 = vld [vmem:[#allocation7 + $0x78] sm:$0xff]  ;;  %s3260_s15 = scalar_lea.hbm %s3341_s6, %s1610_s28  ;;  %s2536_s18 = scalar_lea.vmem %s1403_s24, 32 }
 0x13b   : > { %v437_v14 = vld [vmem:[#allocation7 + $0x68] sm:$0xff]  ;;  %1875 = vmatprep.subr.bf16.mxu0 %v1874_v6  ;;  %v1880_v16 = vpack.c.bf16 %v433_v13, %v430_v12  ;;  %v436_v18 = vld [vmem:[#allocation7 + $0x60] sm:$0xff]  ;;  %v443_v20 = vld [vmem:[#allocation7 + $0x98] sm:$0xff]  ;;  %p2537_p5 = scmp.ne.s32.totalorder %s1403_s24, %s2536_s18  ;;  %p3373_p2 = scmp.ne.s32.totalorder %s3360_s20, 0 }
 0x13c   : > { %1877 = vmatpush1.bf16.msra.mxu0 %v1876_v10  ;;  %v1882_v17 = vpack.c.bf16 %v440_v15, %v437_v14  ;;  %v446_v21 = vld [vmem:[#allocation7 + $0xb0] sm:$0xff]  ;;  %v429_v23 = vld [vmem:[#allocation7 + $0x28] sm:$0xff]  ;;  %v1884_v24 = vpack.c.bf16 %v439_v19, %v436_v18  ;;  %v432_v26 = vld [vmem:[#allocation7 + $0x40] sm:$0xff]  ;;  %p2543_p11 = scmp.lt.s32.totalorder %s1403_s24, %s1403_s24  ;;  %p2544_p13 = scmp.lt.s32.totalorder %s2536_s18, %s2536_s18 }
 0x13d   : > { %1879 = vmatprep.subr.bf16.mxu0 %v1878_v11  ;;  %v426_v22 = vld [vmem:[#allocation7 + $0x10] sm:$0xff]  ;;  %v1886_v27 = vpack.c.bf16 %v446_v21, %v443_v20  ;;  %v445_v29 = vld [vmem:[#allocation7 + $0xa8] sm:$0xff]  ;;  %v435_v30 = vld [vmem:[#allocation7 + $0x58] sm:$0xff]  ;;  %p2538_p4 = pnand %p2537_p5, %p3373_p2 }
 0x13e   : > { %v1907_v25 = vpack.c.bf16 %v429_v23, %v426_v22  ;;  %v442_v28 = vld [vmem:[#allocation7 + $0x90] sm:$0xff]  ;;  %v449_v31 = vld [vmem:[#allocation7 + $0xc8] sm:$0xff]  ;;  %v452_v32 = vld [vmem:[#allocation7 + $0xe0] sm:$0xff]  ;;  %v1910_v33 = vpack.c.bf16 %v435_v30, %v432_v26  ;;  %p2545_p0 = por %p2544_p13, %p2543_p11 }
 0x13f   : > { %v438_v34 = vld [vmem:[#allocation7 + $0x70] sm:$0xff]  ;;  %v441_v35 = vld [vmem:[#allocation7 + $0x88] sm:$0xff]  ;;  %v1888_v36 = vpack.c.bf16 %v445_v29, %v442_v28  ;;  %v1890_v37 = vpack.c.bf16 %v452_v32, %v449_v31  ;;  %v448_v38 = vld [vmem:[#allocation7 + $0xc0] sm:$0xff]  ;;  %p2539_p7 = pneg %p2538_p4 }
 0x140   : > { %1881 = vmatpush1.bf16.msra.mxu0 %v1880_v16  ;;  %1908 = vmatpush3.bf16.msra.mxu1 %v1907_v25  ;;  %v451_v39 = vld [vmem:[#allocation7 + $0xd8] sm:$0xff]  ;;  %v458_v41 = vld [vmem:[#allocation7 + $0x110] sm:$0xff]  ;;  %v1913_v42 = vpack.c.bf16 %v441_v35, %v438_v34  ;;  %v444_v43 = vld [vmem:[#allocation7 + $0xa0] sm:$0xff] }
 0x141   : > { %1883 = vmatprep.subr.bf16.mxu0 %v1882_v17  ;;  %1909 = vmatprep.subr.bf16.mxu1 %v2686_v1  ;;  %v455_v40 = vld [vmem:[#allocation7 + $0xf8] sm:$0xff]  ;;  %v1892_v45 = vpack.c.bf16 %v451_v39, %v448_v38  ;;  %v454_v47 = vld [vmem:[#allocation7 + $0xf0] sm:$0xff]  ;;  %v457_v48 = vld [vmem:[#allocation7 + $0x108] sm:$0xff]  ;;  %p2546_p6 = pnand %p2545_p0, %p2539_p7 }
 0x142   : > { %v447_v44 = vld [vmem:[#allocation7 + $0xb8] sm:$0xff]  ;;  %v1894_v46 = vpack.c.bf16 %v458_v41, %v455_v40  ;;  %v461_v49 = vld [vmem:[#allocation7 + $0x128] sm:$0xff]  ;;  %v464_v50 = vld [vmem:[#allocation7 + $0x140] sm:$0xff]  ;;  %v1896_v54 = vpack.c.bf16 %v457_v48, %v454_v47 }
 0x143   : > { %v1916_v51 = vpack.c.bf16 %v447_v44, %v444_v43  ;;  %v450_v52 = vld [vmem:[#allocation7 + $0xd0] sm:$0xff]  ;;  %v453_v53 = vld [vmem:[#allocation7 + $0xe8] sm:$0xff]  ;;  %v1898_v55 = vpack.c.bf16 %v464_v50, %v461_v49  ;;  %v460_v56 = vld [vmem:[#allocation7 + $0x120] sm:$0xff] }
 0x144   : > { %1885 = vmatpush1.bf16.msra.mxu0 %v1884_v24  ;;  %1911 = vmatpush3.bf16.msra.mxu1 %v1910_v33  ;;  %v463_v57 = vld [vmem:[#allocation7 + $0x138] sm:$0xff]  ;;  %v470_v59 = vld [vmem:[#allocation7 + $0x170] sm:$0xff]  ;;  %v1919_v60 = vpack.c.bf16 %v453_v53, %v450_v52  ;;  %v456_v61 = vld [vmem:[#allocation7 + $0x100] sm:$0xff] }
 0x145   : > { %1887 = vmatprep.subr.bf16.mxu0 %v1886_v27  ;;  %1912 = vmatprep.subr.bf16.mxu1 %v2686_v1  ;;  %v467_v58 = vld [vmem:[#allocation7 + $0x158] sm:$0xff]  ;;  %v1900_v63 = vpack.c.bf16 %v463_v57, %v460_v56  ;;  %v466_v3 = vld [vmem:[#allocation7 + $0x150] sm:$0xff]  ;;  %v469_v4 = vld [vmem:[#allocation7 + $0x168] sm:$0xff] }
 0x146   : > { %v459_v62 = vld [vmem:[#allocation7 + $0x118] sm:$0xff]  ;;  %v1902_v0 = vpack.c.bf16 %v470_v59, %v467_v58  ;;  %v631_v5 = vld [vmem:[#allocation10 + $0x8] sm:$0xff]  ;;  %v634_v6 = vld [vmem:[#allocation10 + $0x20] sm:$0xff]  ;;  %v1904_v10 = vpack.c.bf16 %v469_v4, %v466_v3 }
 0x147   : > { %v1922_v7 = vpack.c.bf16 %v459_v62, %v456_v61  ;;  %v462_v8 = vld [vmem:[#allocation7 + $0x130] sm:$0xff]  ;;  %v465_v9 = vld [vmem:[#allocation7 + $0x148] sm:$0xff]  ;;  %v3027_v11 = vpack.c.bf16 %v634_v6, %v631_v5  ;;  %v630_v12 = vld [vmem:[#allocation10] sm:$0xff] }
 0x148   : > { %1889 = vmatpush1.bf16.msra.mxu0 %v1888_v36  ;;  %1914 = vmatpush3.bf16.msra.mxu1 %v1913_v42  ;;  %v633_v13 = vld [vmem:[#allocation10 + $0x18] sm:$0xff]  ;;  %v640_v15 = vld [vmem:[#allocation10 + $0x50] sm:$0xff]  ;;  %v1925_v16 = vpack.c.bf16 %v465_v9, %v462_v8  ;;  %v468_v17 = vld [vmem:[#allocation7 + $0x160] sm:$0xff] }
 0x149   : > { %1891 = vmatprep.subr.bf16.mxu0 %v1890_v37  ;;  %1915 = vmatprep.subr.bf16.mxu1 %v2686_v1  ;;  %v637_v14 = vld [vmem:[#allocation10 + $0x38] sm:$0xff]  ;;  %v3030_v20 = vpack.c.bf16 %v633_v13, %v630_v12  ;;  %v636_v22 = vld [vmem:[#allocation10 + $0x30] sm:$0xff]  ;;  %v639_v23 = vld [vmem:[#allocation10 + $0x48] sm:$0xff] }
 0x14a   : > { %v471_v18 = vld [vmem:[#allocation7 + $0x178] sm:$0xff]  ;;  %v3033_v21 = vpack.c.bf16 %v640_v15, %v637_v14  ;;  %v643_v24 = vld [vmem:[#allocation10 + $0x68] sm:$0xff]  ;;  %v646_v25 = vld [vmem:[#allocation10 + $0x80] sm:$0xff]  ;;  %v3037_v29 = vpack.c.bf16 %v639_v23, %v636_v22 }
 0x14b   : > { %v423_v19 = vld [vmem:[#allocation3] sm:$0xff]  ;;  %v1928_v26 = vpack.c.bf16 %v471_v18, %v468_v17  ;;  %v632_v27 = vld [vmem:[#allocation10 + $0x10] sm:$0xff]  ;;  %v635_v28 = vld [vmem:[#allocation10 + $0x28] sm:$0xff]  ;;  %v3041_v30 = vpack.c.bf16 %v646_v25, %v643_v24 }
 0x14c   : > { %1893 = vmatpush1.bf16.msra.mxu0 %v1892_v45  ;;  %1917 = vmatpush3.bf16.msra.mxu1 %v1916_v51  ;;  %v642_v31 = vld [vmem:[#allocation10 + $0x60] sm:$0xff]  ;;  %v645_v32 = vld [vmem:[#allocation10 + $0x78] sm:$0xff]  ;;  %v652_v34 = vld [vmem:[#allocation10 + $0xb0] sm:$0xff]  ;;  %v3043_v35 = vpack.c.bf16 %v635_v28, %v632_v27 }
 0x14d   : > { %1895 = vmatprep.subr.bf16.mxu0 %v1894_v46  ;;  %1918 = vmatprep.subr.bf16.mxu1 %v2686_v1  ;;  %v649_v33 = vld [vmem:[#allocation10 + $0x98] sm:$0xff]  ;;  %v638_v36 = vld [vmem:[#allocation10 + $0x40] sm:$0xff]  ;;  %v3047_v38 = vpack.c.bf16 %v645_v32, %v642_v31  ;;  %v648_v40 = vld [vmem:[#allocation10 + $0x90] sm:$0xff] }
 0x14e   : > { %v641_v37 = vld [vmem:[#allocation10 + $0x58] sm:$0xff]  ;;  %v3050_v39 = vpack.c.bf16 %v652_v34, %v649_v33  ;;  %v651_v41 = vld [vmem:[#allocation10 + $0xa8] sm:$0xff]  ;;  %v658_v43 = vld [vmem:[#allocation10 + $0xe0] sm:$0xff]  ;;  %v474_v34 = vlaneseq }
 0x14f   : > { %v655_v42 = vld [vmem:[#allocation10 + $0xc8] sm:$0xff]  ;;  %v3053_v44 = vpack.c.bf16 %v641_v37, %v638_v36  ;;  %v644_v45 = vld [vmem:[#allocation10 + $0x70] sm:$0xff]  ;;  %v3059_v47 = vpack.c.bf16 %v651_v41, %v648_v40  ;;  %v654_v49 = vld [vmem:[#allocation10 + $0xc0] sm:$0xff] }
 0x150   : > { %1897 = vmatpush1.bf16.msra.mxu0 %v1896_v54  ;;  %1920 = vmatpush3.bf16.msra.mxu1 %v1919_v60  ;;  %v647_v46 = vld [vmem:[#allocation10 + $0x88] sm:$0xff]  ;;  %v3062_v48 = vpack.c.bf16 %v658_v43, %v655_v42  ;;  %v657_v50 = vld [vmem:[#allocation10 + $0xd8] sm:$0xff]  ;;  %v664_v52 = vld [vmem:[#allocation10 + $0x110] sm:$0xff]  ;;  %v475_v36 = vshrl.u32 %v474_v34, 7 }
 0x151   : > { %1899 = vmatprep.subr.bf16.mxu0 %v1898_v55  ;;  %1921 = vmatprep.subr.bf16.mxu1 %v2686_v1  ;;  %v661_v51 = vld [vmem:[#allocation10 + $0xf8] sm:$0xff]  ;;  %v3065_v53 = vpack.c.bf16 %v647_v46, %v644_v45  ;;  %v650_v54 = vld [vmem:[#allocation10 + $0xa0] sm:$0xff]  ;;  %v3069_v56 = vpack.c.bf16 %v657_v50, %v654_v49  ;;  %v660_v58 = vld [vmem:[#allocation10 + $0xf0] sm:$0xff] }
 0x152   : > { %v653_v55 = vld [vmem:[#allocation10 + $0xb8] sm:$0xff]  ;;  %v3072_v57 = vpack.c.bf16 %v664_v52, %v661_v51  ;;  %v663_v59 = vld [vmem:[#allocation10 + $0x108] sm:$0xff]  ;;  %v670_v61 = vld [vmem:[#allocation10 + $0x140] sm:$0xff]  ;;  %v476_v37 = vsub.s32 0, %v475_v36  ;;  %v480_v41 = vsub.s32 1, %v475_v36 }
 0x153   : > { %v667_v60 = vld [vmem:[#allocation10 + $0x128] sm:$0xff]  ;;  %v3075_v62 = vpack.c.bf16 %v653_v55, %v650_v54  ;;  %v3079_v3 = vpack.c.bf16 %v663_v59, %v660_v58  ;;  %v666_v5 = vld [vmem:[#allocation10 + $0x120] sm:$0xff]  ;;  %v669_v6 = vld [vmem:[#allocation10 + $0x138] sm:$0xff] }
 0x154   : > { %1901 = vmatpush1.bf16.msra.mxu0 %v1900_v63  ;;  %1923 = vmatpush3.bf16.msra.mxu1 %v1922_v7  ;;  %v656_v63 = vld [vmem:[#allocation10 + $0xd0] sm:$0xff]  ;;  %v3082_v4 = vpack.c.bf16 %v670_v61, %v667_v60  ;;  %v673_v7 = vld [vmem:[#allocation10 + $0x158] sm:$0xff]  ;;  %v3089_v13 = vpack.c.bf16 %v669_v6, %v666_v5  ;;  %v674_v24 = vld [vmem:[#allocation10 + $0x160] sm:$0xff]  ;;  %v484_v60 = vsub.s32 2, %v475_v36 }
 0x155   : > { %1903 = vmatprep.subr.bf16.mxu0 %v1902_v0  ;;  %1924 = vmatprep.subr.bf16.mxu1 %v2686_v1  ;;  %v659_v0 = vld [vmem:[#allocation10 + $0xe8] sm:$0xff]  ;;  %v676_v8 = vld [vmem:[#allocation10 + $0x170] sm:$0xff]  ;;  %v665_v12 = vld [vmem:[#allocation10 + $0x118] sm:$0xff] }
 0x156   : > { %v3085_v9 = vpack.c.bf16 %v659_v0, %v656_v63  ;;  %v3092_v14 = vpack.c.bf16 %v676_v8, %v673_v7  ;;  %v672_v15 = vld [vmem:[#allocation10 + $0x150] sm:$0xff]  ;;  %v677_v25 = vld [vmem:[#allocation10 + $0x178] sm:$0xff]  ;;  %v3165_v61 = vld [vmem:[%s3340_s5] ss:$0 sm:$0xff] }
 0x157   : > { %v668_v18 = vld [vmem:[#allocation10 + $0x130] sm:$0xff]  ;;  %v3111_v27 = vpack.c.bf16 %v677_v25, %v674_v24 }
 0x158   : > { %1905 = vmatpush1.bf16.msra.mxu0 %v1904_v10  ;;  %1926 = vmatpush3.bf16.msra.mxu1 %v1925_v16  ;;  %v662_v10 = vld [vmem:[#allocation10 + $0x100] sm:$0xff]  ;;  %v675_v16 = vld [vmem:[#allocation10 + $0x168] sm:$0xff] }
 0x159   : > { %1931 = vmatprep.subr.bf16.mxu0 %v3027_v11  ;;  %1927 = vmatprep.subr.bf16.mxu1 %v2686_v1  ;;  %v3095_v17 = vpack.c.bf16 %v665_v12, %v662_v10  ;;  %v3099_v22 = vpack.c.bf16 %v675_v16, %v672_v15  ;;  %v472_v40 = vld [vmem:[%s3339_s4] sm:$0x7] }
 0x15a   : > { %v477_v42 = vrot.slane %v472_v40, %v476_v37  ;;  %v481_v43 = vrot.slane %v472_v40, %v480_v41  ;;  %v485_v0 = vrot.slane %v472_v40, %v484_v60 }
 0x15b   : > { %554 = vmatmul.mubr.f32.vlgmr.msra.gmra.mrb[0].mxu0 %v423_v19 }
 0x15c   : > { %1933 = vmatpush1.bf16.msra.mxu0 %v3030_v20  ;;  %744 = vmatprep.mubr.f32.mxu0 %v2687_v2 }
 0x15d   : > { %1935 = vmatprep.subr.bf16.mxu0 %v3033_v21  ;;  %1929 = vmatpush3.bf16.msra.mxu1 %v1928_v26  ;;  %v3107_v26 = vld [vmem:[#allocation2] sm:$0x3] }
 0x15e   : > { %1962 = vmatprep.subr.bf16.mxu1 %v2686_v1 }
 0x160   : > { %1937 = vmatpush1.bf16.msra.mxu0 %v3037_v29  ;;  %1732 = vmatmul.mubr.f32.vlgmr.msra.gmra.mrb[0].mxu1 %v423_v19  ;;  %v671_v19 = vld [vmem:[#allocation10 + $0x148] sm:$0xff] }
 0x161   : > { %1939 = vmatprep.subr.bf16.mxu0 %v3041_v30  ;;  %1964 = vmatpush3.bf16.msra.mxu1 %v3043_v35  ;;  %v3103_v23 = vpack.c.bf16 %v671_v19, %v668_v18 }
 0x162   : > { %1766 = vmatprep.mubr.msk.f32.mxu1 %vm2688_vm0, %v2687_v2  ;;  %1965 = vmatprep.subr.bf16.mxu1 %v2686_v1 }
 0x164   : > { %1941 = vmatpush1.bf16.msra.mxu0 %v3047_v38 }
 0x165   : > { %1943 = vmatprep.subr.bf16.mxu0 %v3050_v39  ;;  %1967 = vmatpush3.bf16.msra.mxu1 %v3053_v44 }
 0x166   : > { %1968 = vmatprep.subr.bf16.mxu1 %v2686_v1 }
 0x168   : > { %1945 = vmatpush1.bf16.msra.mxu0 %v3059_v47 }
 0x169   : > { %1947 = vmatprep.subr.bf16.mxu0 %v3062_v48  ;;  %1970 = vmatpush3.bf16.msra.mxu1 %v3065_v53 }
 0x16a   : > { %1971 = vmatprep.subr.bf16.mxu1 %v2686_v1 }
 0x16c   : > { %1949 = vmatpush1.bf16.msra.mxu0 %v3069_v56 }
 0x16d   : > { %1951 = vmatprep.subr.bf16.mxu0 %v3072_v57  ;;  %1973 = vmatpush3.bf16.msra.mxu1 %v3075_v62 }
 0x16e   : > { %1974 = vmatprep.subr.bf16.mxu1 %v2686_v1 }
 0x170   : > { %1953 = vmatpush1.bf16.msra.mxu0 %v3079_v3 }
 0x171   : > { %1955 = vmatprep.subr.bf16.mxu0 %v3082_v4  ;;  %1976 = vmatpush3.bf16.msra.mxu1 %v3085_v9 }
 0x172   : > { %1977 = vmatprep.subr.bf16.mxu1 %v2686_v1 }
 0x174   : > { %1957 = vmatpush1.bf16.msra.mxu0 %v3089_v13 }
 0x175   : > { %1959 = vmatprep.subr.bf16.mxu0 %v3092_v14  ;;  %1979 = vmatpush3.bf16.msra.mxu1 %v3095_v17 }
 0x176   : > { %1980 = vmatprep.subr.bf16.mxu1 %v2686_v1 }
 0x178   : > { %1961 = vmatpush1.bf16.msra.mxu0 %v3099_v22 }
 0x179   : > { %1987 = vmatprep.subr.bf16.mxu0 %v3027_v11  ;;  %1982 = vmatpush3.bf16.msra.mxu1 %v3103_v23 }
 0x17a   : > { %1983 = vmatprep.subr.bf16.mxu1 %v2686_v1 }
 0x17b   : > { %745 = vmatmul.mubr.f32.vlgmr.msra.gmra.mrb[2].mxu0 %v3107_v26 }
 0x17c   : > { %1989 = vmatpush1.bf16.msra.mxu0 %v3030_v20  ;;  %909 = vmatprep.mubr.f32.mxu0 %v2687_v2 }
 0x17d   : > { %1991 = vmatprep.subr.bf16.mxu0 %v3033_v21  ;;  %1985 = vmatpush3.bf16.msra.mxu1 %v3111_v27 }
 0x17e   : > { %2018 = vmatprep.subr.bf16.mxu1 %v2686_v1 }
 0x180   : > { %1993 = vmatpush1.bf16.msra.mxu0 %v3037_v29  ;;  %1767 = vmatmul.mubr.f32.vlgmr.msra.gmra.mrb[2].mxu1 %v3107_v26 }
 0x181   : > { %1995 = vmatprep.subr.bf16.mxu0 %v3041_v30  ;;  %2020 = vmatpush3.bf16.msra.mxu1 %v3043_v35 }
 0x182   : > { %1801 = vmatprep.mubr.msk.f32.mxu1 %vm2688_vm0, %v2687_v2  ;;  %2021 = vmatprep.subr.bf16.mxu1 %v2686_v1 }
 0x184   : > { %1997 = vmatpush1.bf16.msra.mxu0 %v3047_v38 }
 0x185   : > { %1999 = vmatprep.subr.bf16.mxu0 %v3050_v39  ;;  %2023 = vmatpush3.bf16.msra.mxu1 %v3053_v44 }
 0x186   : > { %2024 = vmatprep.subr.bf16.mxu1 %v2686_v1 }
 0x188   : > { %2001 = vmatpush1.bf16.msra.mxu0 %v3059_v47 }
 0x189   : > { %2003 = vmatprep.subr.bf16.mxu0 %v3062_v48  ;;  %2026 = vmatpush3.bf16.msra.mxu1 %v3065_v53 }
 0x18a   : > { %2027 = vmatprep.subr.bf16.mxu1 %v2686_v1 }
 0x18c   : > { %2005 = vmatpush1.bf16.msra.mxu0 %v3069_v56 }
 0x18d   : > { %2007 = vmatprep.subr.bf16.mxu0 %v3072_v57  ;;  %2029 = vmatpush3.bf16.msra.mxu1 %v3075_v62 }
 0x18e   : > { %2030 = vmatprep.subr.bf16.mxu1 %v2686_v1 }
 0x190   : > { %2009 = vmatpush1.bf16.msra.mxu0 %v3079_v3 }
 0x191   : > { %2011 = vmatprep.subr.bf16.mxu0 %v3082_v4  ;;  %2032 = vmatpush3.bf16.msra.mxu1 %v3085_v9 }
 0x192   : > { %2033 = vmatprep.subr.bf16.mxu1 %v2686_v1 }
 0x194   : > { %2013 = vmatpush1.bf16.msra.mxu0 %v3089_v13 }
 0x195   : > { %2015 = vmatprep.subr.bf16.mxu0 %v3092_v14  ;;  %2035 = vmatpush3.bf16.msra.mxu1 %v3095_v17 }
 0x196   : > { %2036 = vmatprep.subr.bf16.mxu1 %v2686_v1 }
 0x198   : > { %2017 = vmatpush1.bf16.msra.mxu0 %v3099_v22 }
 0x199   : > { %2043 = vmatprep.subr.bf16.mxu0 %v3027_v11  ;;  %2038 = vmatpush3.bf16.msra.mxu1 %v3103_v23 }
 0x19a   : > { %2039 = vmatprep.subr.bf16.mxu1 %v2686_v1 }
 0x19d   : > { %2041 = vmatpush3.bf16.msra.mxu1 %v3111_v27 }
 0x19e   : > { %2074 = vmatprep.subr.bf16.mxu1 %v2686_v1 }
 0x22e   : > { %v555_v28 = vpop.f32.mrb[0].mxu0 }
 0x22f   : > { %v557_v31 = vpop.f32.mrb[1].mxu0  ;;  %v3156_v45 = vadd.f32 %v555_v28, %v477_v42 }
 0x230   : > { %v3159_v51 = vadd.f32 %v557_v31, %v481_v43 }
 0x233   : > { %v626_v32 = vpop.f32.mrb[0].mxu1 }
 0x234   : > { %v1733_v33 = vpop.f32.mrb[1].mxu1  ;;  %v3168_v8 = vadd.f32 %v626_v32, %v485_v0 }
 0x24e   : > { %v746_v46 = vpop.f32.mrb[2].mxu0 }
 0x24f   : > { %v821_v49 = vadd.f32 %v746_v46, %v3156_v45  ;;  %v748_v50 = vpop.f32.mrb[3].mxu0 }
 0x250   : > { %v826_v54 = vadd.f32 %v748_v50, %v3159_v51 }
 0x251   : > { %v822_v52 = vmul.f32 0.5, %v821_v49 }
 0x252   : > { %v827_v59 = vmul.f32 0.5, %v826_v54 }
 0x253   : > { %2254 = vtanh.f32 %v822_v52  ;;  %v817_v55 = vpop.f32.mrb[2].mxu1 }
 0x254   : > { %v1768_v58 = vpop.f32.mrb[3].mxu1  ;;  %2256 = vtanh.f32 %v827_v59  ;;  %v837_v6 = vadd.f32 %v3165_v61, %v817_v55 }
 0x25d   : > { %v2255_v63 = vpop.eup %2254 }
 0x25e   : > { %v824_v5 = vadd.f32 1.0, %v2255_v63  ;;  %v2257_v12 = vpop.eup %2256 }
 0x25f   : > { %v829_v16 = vadd.f32 1.0, %v2257_v12 }
 0x260   : > { %v825_v7 = vmul.f32 0.5, %v824_v5 }
 0x261   : > { %v830_v18 = vmul.f32 0.5, %v829_v16 }
 0x262   : > { %v838_v10 = vmul.f32 %v837_v6, %v825_v7 }
 0x263   : > { %v841_v19 = vsub.f32 1.0, %v830_v18  ;;  %v843_v25 = vmul.f32 %v830_v18, %v3107_v26 }
 0x264   : > { %v839_v15 = vadd.f32 %v838_v10, %v3168_v8 }
 0x266   : > { %2258 = vtanh.f32 %v839_v15 }
 0x270   : > { %v2259_v24 = vpop.eup %2258 }
 0x271   : > { %v842_v28 = vmul.f32 %v2259_v24, %v841_v19 }
 0x273   : > { %v844_v31 = vadd.f32 %v843_v25, %v842_v28 }
 0x275   : > { %910 = vmatmul.mubr.f32.vlgmr.msra.gmra.mrb[4].mxu0 %v844_v31  ;;  %1365 = vst [vmem:[%s2884_s8] sm:$0x3] %v844_v31  ;;  %1802 = vmatmul.mubr.f32.vlgmr.msra.gmra.mrb[4].mxu1 %v844_v31  ;;  %v1012_v59 = vrot.slane %v844_v31, 6 }
 0x276   : > { %2045 = vmatpush1.bf16.msra.mxu0 %v3030_v20  ;;  %2076 = vmatpush3.bf16.msra.mxu1 %v3043_v35 }
 0x277   : > { %2047 = vmatprep.subr.bf16.mxu0 %v3033_v21  ;;  %2077 = vmatprep.subr.bf16.mxu1 %v2686_v1 }
 0x278   : > { %1083 = vmatprep.mubr.f32.mxu0 %v2687_v2  ;;  %1836 = vmatprep.mubr.msk.f32.mxu1 %vm2688_vm0, %v2687_v2 }
 0x27a   : > { %2049 = vmatpush1.bf16.msra.mxu0 %v3037_v29  ;;  %2079 = vmatpush3.bf16.msra.mxu1 %v3053_v44 }
 0x27b   : > { %2051 = vmatprep.subr.bf16.mxu0 %v3041_v30  ;;  %2080 = vmatprep.subr.bf16.mxu1 %v2686_v1 }
 0x27e   : > { %2053 = vmatpush1.bf16.msra.mxu0 %v3047_v38  ;;  %2082 = vmatpush3.bf16.msra.mxu1 %v3065_v53 }
 0x27f   : > { %2055 = vmatprep.subr.bf16.mxu0 %v3050_v39  ;;  %2083 = vmatprep.subr.bf16.mxu1 %v2686_v1 }
 0x282   : > { %2057 = vmatpush1.bf16.msra.mxu0 %v3059_v47  ;;  %2085 = vmatpush3.bf16.msra.mxu1 %v3075_v62 }
 0x283   : > { %2059 = vmatprep.subr.bf16.mxu0 %v3062_v48  ;;  %2086 = vmatprep.subr.bf16.mxu1 %v2686_v1 }
 0x286   : > { %2061 = vmatpush1.bf16.msra.mxu0 %v3069_v56  ;;  %2088 = vmatpush3.bf16.msra.mxu1 %v3085_v9 }
 0x287   : > { %2063 = vmatprep.subr.bf16.mxu0 %v3072_v57  ;;  %2089 = vmatprep.subr.bf16.mxu1 %v2686_v1 }
 0x28a   : > { %2065 = vmatpush1.bf16.msra.mxu0 %v3079_v3  ;;  %2091 = vmatpush3.bf16.msra.mxu1 %v3095_v17 }
 0x28b   : > { %2067 = vmatprep.subr.bf16.mxu0 %v3082_v4  ;;  %2092 = vmatprep.subr.bf16.mxu1 %v2686_v1 }
 0x28e   : > { %2069 = vmatpush1.bf16.msra.mxu0 %v3089_v13  ;;  %2094 = vmatpush3.bf16.msra.mxu1 %v3103_v23 }
 0x28f   : > { %2071 = vmatprep.subr.bf16.mxu0 %v3092_v14  ;;  %2095 = vmatprep.subr.bf16.mxu1 %v2686_v1 }
 0x292   : > { %2073 = vmatpush1.bf16.msra.mxu0 %v3099_v22  ;;  %2097 = vmatpush3.bf16.msra.mxu1 %v3111_v27 }
 0x293   : > { %2099 = vmatprep.subr.bf16.mxu0 %v3027_v11  ;;  %2130 = vmatprep.subr.bf16.mxu1 %v2686_v1 }
 0x348   : > { %v911_v26 = vpop.f32.mrb[4].mxu0  ;;  %v982_v32 = vpop.f32.mrb[4].mxu1 }
 0x349   : > { %v987_v33 = vrot.slane %v911_v26, 6  ;;  %v913_v34 = vpop.f32.mrb[5].mxu0  ;;  %v1803_v36 = vpop.f32.mrb[5].mxu1  ;;  %v1002_v46 = vadd.f32 %v3165_v61, %v982_v32 }
 0x34a   : > { %v995_v37 = vrot.slane %v913_v34, 6 }
 0x34b   : > { %v989_v40 = vadd.f32 %v987_v33, %v3156_v45  ;;  %v1004_v55 = vrot.slane %v1002_v46, 6 }
 0x34c   : > { %v997_v41 = vadd.f32 %v995_v37, %v3159_v51 }
 0x34d   : > { %v990_v42 = vmul.f32 0.5, %v989_v40 }
 0x34e   : > { %v998_v43 = vmul.f32 0.5, %v997_v41 }
 0x34f   : > { %2260 = vtanh.f32 %v990_v42 }
 0x350   : > { %2262 = vtanh.f32 %v998_v43 }
 0x359   : > { %v2261_v49 = vpop.eup %2260 }
 0x35a   : > { %v2263_v11 = vpop.eup %2262  ;;  %v992_v50 = vadd.f32 1.0, %v2261_v49 }
 0x35b   : > { %v1000_v52 = vadd.f32 1.0, %v2263_v11 }
 0x35c   : > { %v993_v54 = vmul.f32 0.5, %v992_v50 }
 0x35d   : > { %v1001_v58 = vmul.f32 0.5, %v1000_v52 }
 0x35e   : > { %v1006_v60 = vmul.f32 %v1004_v55, %v993_v54 }
 0x35f   : > { %v1014_v63 = vmul.f32 %v1012_v59, %v1001_v58  ;;  %v1009_v5 = vsub.f32 1.0, %v1001_v58 }
 0x360   : > { %v1007_v0 = vadd.f32 %v1006_v60, %v3168_v8 }
 0x362   : > { %2264 = vtanh.f32 %v1007_v0 }
 0x36c   : > { %v2265_v6 = vpop.eup %2264 }
 0x36d   : > { %v1010_v7 = vmul.f32 %v2265_v6, %v1009_v5 }
 0x36f   : > { %v1015_v10 = vadd.f32 %v1014_v63, %v1010_v7 }
 0x371   : > { %v1017_v12 = vrot.slane %v1015_v10, 2 }
 0x373   : > { %1084 = vmatmul.mubr.f32.vlgmr.msra.gmra.mrb[6].mxu0 %v1017_v12  ;;  %1366 = vst [vmem:[%s2884_s8 + $0x2] sm:$0x3] %v1017_v12  ;;  %1837 = vmatmul.mubr.f32.vlgmr.msra.gmra.mrb[6].mxu1 %v1017_v12 }
 0x374   : > { %2101 = vmatpush1.bf16.msra.mxu0 %v3030_v20  ;;  %2132 = vmatpush3.bf16.msra.mxu1 %v3043_v35 }
 0x375   : > { %2103 = vmatprep.subr.bf16.mxu0 %v3033_v21  ;;  %2133 = vmatprep.subr.bf16.mxu1 %v2686_v1 }
 0x376   : > { %1256 = vmatprep.mubr.f32.mxu0 %v2687_v2  ;;  %1871 = vmatprep.mubr.msk.f32.mxu1 %vm2688_vm0, %v2687_v2 }
 0x378   : > { %2105 = vmatpush1.bf16.msra.mxu0 %v3037_v29  ;;  %2135 = vmatpush3.bf16.msra.mxu1 %v3053_v44 }
 0x379   : > { %2107 = vmatprep.subr.bf16.mxu0 %v3041_v30  ;;  %2136 = vmatprep.subr.bf16.mxu1 %v2686_v1 }
 0x37c   : > { %2109 = vmatpush1.bf16.msra.mxu0 %v3047_v38  ;;  %2138 = vmatpush3.bf16.msra.mxu1 %v3065_v53 }
 0x37d   : > { %2111 = vmatprep.subr.bf16.mxu0 %v3050_v39  ;;  %2139 = vmatprep.subr.bf16.mxu1 %v2686_v1 }
 0x380   : > { %2113 = vmatpush1.bf16.msra.mxu0 %v3059_v47  ;;  %2141 = vmatpush3.bf16.msra.mxu1 %v3075_v62 }
 0x381   : > { %2115 = vmatprep.subr.bf16.mxu0 %v3062_v48  ;;  %2142 = vmatprep.subr.bf16.mxu1 %v2686_v1 }
 0x384   : > { %2117 = vmatpush1.bf16.msra.mxu0 %v3069_v56  ;;  %2144 = vmatpush3.bf16.msra.mxu1 %v3085_v9  ;;  %v1185_v9 = vrot.slane %v1015_v10, 6 }
 0x385   : > { %2119 = vmatprep.subr.bf16.mxu0 %v3072_v57  ;;  %2145 = vmatprep.subr.bf16.mxu1 %v2686_v1 }
 0x388   : > { %2121 = vmatpush1.bf16.msra.mxu0 %v3079_v3  ;;  %2147 = vmatpush3.bf16.msra.mxu1 %v3095_v17 }
 0x389   : > { %2123 = vmatprep.subr.bf16.mxu0 %v3082_v4  ;;  %2148 = vmatprep.subr.bf16.mxu1 %v2686_v1 }
 0x38c   : > { %2125 = vmatpush1.bf16.msra.mxu0 %v3089_v13  ;;  %2150 = vmatpush3.bf16.msra.mxu1 %v3103_v23 }
 0x38d   : > { %2127 = vmatprep.subr.bf16.mxu0 %v3092_v14  ;;  %2151 = vmatprep.subr.bf16.mxu1 %v2686_v1 }
 0x390   : > { %2129 = vmatpush1.bf16.msra.mxu0 %v3099_v22  ;;  %2153 = vmatpush3.bf16.msra.mxu1 %v3111_v27 }
 0x446   : > { %v1085_v2 = vpop.f32.mrb[6].mxu0  ;;  %v1156_v20 = vpop.f32.mrb[6].mxu1 }
 0x447   : > { %v1161_v21 = vrot.slane %v1085_v2, 4  ;;  %v1087_v29 = vpop.f32.mrb[7].mxu0  ;;  %v1838_v30 = vpop.f32.mrb[7].mxu1  ;;  %v1176_v1 = vadd.f32 %v3165_v61, %v1156_v20 }
 0x448   : > { %v1169_v35 = vrot.slane %v1087_v29, 4 }
 0x449   : > { %v1163_v38 = vadd.f32 %v1161_v21, %v3156_v45  ;;  %v1178_v3 = vrot.slane %v1176_v1, 4 }
 0x44a   : > { %v1171_v39 = vadd.f32 %v1169_v35, %v3159_v51 }
 0x44b   : > { %v1164_v44 = vmul.f32 0.5, %v1163_v38 }
 0x44c   : > { %v1172_v47 = vmul.f32 0.5, %v1171_v39 }
 0x44d   : > { %2266 = vtanh.f32 %v1164_v44 }
 0x44e   : > { %2268 = vtanh.f32 %v1172_v47 }
 0x457   : > { %v2267_v48 = vpop.eup %2266 }
 0x458   : > { %v2269_v53 = vpop.eup %2268  ;;  %v1166_v56 = vadd.f32 1.0, %v2267_v48 }
 0x459   : > { %v1174_v57 = vadd.f32 1.0, %v2269_v53 }
 0x45a   : > { %v1167_v62 = vmul.f32 0.5, %v1166_v56 }
 0x45b   : > { %v1175_v4 = vmul.f32 0.5, %v1174_v57 }
 0x45c   : > { %v1180_v13 = vmul.f32 %v1178_v3, %v1167_v62 }
 0x45d   : > { %v1187_v14 = vmul.f32 %v1185_v9, %v1175_v4  ;;  %v1183_v22 = vsub.f32 1.0, %v1175_v4 }
 0x45e   : > { %v1181_v17 = vadd.f32 %v1180_v13, %v3168_v8 }
 0x460   : > { %2270 = vtanh.f32 %v1181_v17 }
 0x46a   : > { %v2271_v23 = vpop.eup %2270 }
 0x46b   : > { %v1184_v27 = vmul.f32 %v2271_v23, %v1183_v22 }
 0x46d   : > { %v1188_v15 = vadd.f32 %v1187_v14, %v1184_v27 }
 0x46f   : > { %v1190_v16 = vrot.slane %v1188_v15, 4  ;;  %v1358_v11 = vrot.slane %v1188_v15, 6 }
 0x471   : > { %1257 = vmatmul.mubr.f32.vlgmr.msra.gmra.mrb[8].mxu0 %v1190_v16  ;;  %1367 = vst [vmem:[%s2884_s8 + $0x4] sm:$0x3] %v1190_v16  ;;  %1872 = vmatmul.mubr.f32.vlgmr.msra.gmra.mrb[8].mxu1 %v1190_v16 }
 0x544   : > { %v1258_v18 = vpop.f32.mrb[8].mxu0  ;;  %v1329_v19 = vpop.f32.mrb[8].mxu1 }
 0x545   : > { %v1334_v24 = vrot.slane %v1258_v18, 2  ;;  %v1260_v25 = vpop.f32.mrb[9].mxu0  ;;  %v1873_v28 = vpop.f32.mrb[9].mxu1  ;;  %v1349_v36 = vadd.f32 %v3165_v61, %v1329_v19 }
 0x546   : > { %v1342_v31 = vrot.slane %v1260_v25, 2 }
 0x547   : > { %v1336_v26 = vadd.f32 %v1334_v24, %v3156_v45  ;;  %v1351_v46 = vrot.slane %v1349_v36, 2 }
 0x548   : > { %v1344_v32 = vadd.f32 %v1342_v31, %v3159_v51 }
 0x549   : > { %v1337_v33 = vmul.f32 0.5, %v1336_v26 }
 0x54a   : > { %v1345_v34 = vmul.f32 0.5, %v1344_v32 }
 0x54b   : > { %2272 = vtanh.f32 %v1337_v33 }
 0x54c   : > { %2274 = vtanh.f32 %v1345_v34 }
 0x555   : > { %v2273_v37 = vpop.eup %2272 }
 0x556   : > { %v2275_v40 = vpop.eup %2274  ;;  %v1339_v41 = vadd.f32 1.0, %v2273_v37 }
 0x557   : > { %v1347_v42 = vadd.f32 1.0, %v2275_v40 }
 0x558   : > { %v1340_v43 = vmul.f32 0.5, %v1339_v41 }
 0x559   : > { %v1348_v49 = vmul.f32 0.5, %v1347_v42 }
 0x55a   : > { %v1353_v50 = vmul.f32 %v1351_v46, %v1340_v43 }
 0x55b   : > { %v1360_v45 = vmul.f32 %v1358_v11, %v1348_v49  ;;  %v1356_v52 = vsub.f32 1.0, %v1348_v49 }
 0x55c   : > { %v1354_v51 = vadd.f32 %v1353_v50, %v3168_v8 }
 0x55e   : > { %2276 = vtanh.f32 %v1354_v51 }
 0x568   : > { %v2277_v54 = vpop.eup %2276 }
 0x569   : > { %v1357_v61 = vmul.f32 %v2277_v54, %v1356_v52 }
 0x56b   : > { %v1361_v55 = vadd.f32 %v1360_v45, %v1357_v61 }
 0x56d   : > { %v1363_v58 = vrot.slane %v1361_v55, 6  ;;  %1369 = vst [vmem:[#allocation2 - $0x6] sm:$0xc0] %v1361_v55  ;;  %1370 = vst [vmem:[#allocation13 - $0x6] sm:$0xc0] %v1361_v55 }
 0x56e   : > { %2549 = shalt.err (!%p2546_p6)
}
 0x56f   : > { %s2550_s0 = scalar_lea.hbm %s3342_s7, 32 }
 0x570   : > { %p2551_p8 = scmp.ne.s32.totalorder %s3342_s7, %s2550_s0  ;;  %p2556_p12 = scmp.lt.u32.totalorder %s2550_s0, %s3342_s7 }
 0x572   : > { %p2552_p9 = pnand %p2551_p8, %p3373_p2 }
 0x574   : > { %p2553_p10 = pneg %p2552_p9 }
 0x576   : > { %p2558_p1 = pnand %p2556_p12, %p2553_p10 }
 0x578   : > { %2561 = shalt.err (!%p2558_p1)
}
 0x579   : > { %2164 = dma.vmem_to_hbm [thread:$0]  (%p3373_p2), %s1403_s24, 32, %s3342_s7, [#allocation14]   ;;  %1368 = vst [vmem:[%s2884_s8 + $0x6] sm:$0x3] %v1363_v58 }
 0x57a   : > { %s3374_s10 = sand.u32 1, %s2654_s12   ;;  %s2562_s13 = scalar_lea.vmem %s3262_s17, 128 }
 0x57b   : > { %s3285_s19 = scalar_lea.sflag [#allocation9], %s3374_s10  ;;  %p2563_p3 = scmp.ne.s32.totalorder %s3262_s17, %s2562_s13 }
 0x57c   : > { %p3375_p5 = scmp.ne.s32.totalorder %s3362_s21, 0  ;;  %s2690_s30 = smov [#allocation12]  }
 0x57d   : > { %s2566_s9 = sshll.u32 %s2690_s30, 4  ;;  %s2567_s9 = int_to_ptr.vmem [resolvable:$false] %s2566_s9 }
 0x57e   : > { %p2564_p4 = pnand %p2563_p3, %p3375_p5  ;;  %s2568_s28 = scalar_lea.vmem %s2567_s9, 256 }
 0x57f   : > { %p2569_p11 = scmp.lt.s32.totalorder %s3262_s17, %s2567_s9  ;;  %p2570_p13 = scmp.lt.s32.totalorder %s2568_s28, %s2562_s13 }
 0x580   : > { %p2565_p7 = pneg %p2564_p4 }
 0x581   : > { %p2571_p0 = por %p2570_p13, %p2569_p11 }
 0x583   : > { %p2572_p6 = pnand %p2571_p0, %p2565_p7 }
 0x585   : > { %2575 = shalt.err (!%p2572_p6)
}
 0x586   : > { %s2576_s8 = scalar_lea.hbm %s3260_s15, 128  ;;  %s2580_s25 = scalar_lea.hbm %s3341_s6, 256 }
 0x587   : > { %p2577_p8 = scmp.ne.s32.totalorder %s3260_s15, %s2576_s8  ;;  %p2581_p12 = scmp.lt.u32.totalorder %s3260_s15, %s3341_s6 }
 0x588   : > { %p2582_p1 = scmp.lt.u32.totalorder %s2580_s25, %s2576_s8  ;;  %p2584_p4 = scmp.lt.u32.totalorder %s2576_s8, %s3260_s15 }
 0x589   : > { %p2578_p9 = pnand %p2577_p8, %p3375_p5 }
 0x58a   : > { %p2583_p3 = por %p2582_p1, %p2581_p12 }
 0x58b   : > { %p2579_p10 = pneg %p2578_p9 }
 0x58c   : > { %p2585_p7 = por %p2584_p4, %p2583_p3 }
 0x58e   : > { %p2586_p11 = pnand %p2585_p7, %p2579_p10 }
 0x590   : > { %2589 = shalt.err (!%p2586_p11)
}
 0x591   : > { %s2691_s26 = smov 32   ;;  %s2692_s0 = smov 2  }
 0x592   : > { %2162 = dma.vmem_to_hbm [thread:$0]  (%p3375_p5), %s3262_s17, 128, %s3260_s15, %s3285_s19, %s2691_s26, %s2691_s26, %s2692_s0  }
 0x593   : > { %2641 = dma.done.wait (%p3373_p2), [#allocation14], 32  }
 0x594   : > { %2643 = vsyncadd (%p3373_p2), [#allocation14], 4294967264 }
 0x595 PF: > { %s3376_s29 = sld [smem:[#allocation46_spill]]  ;;  %s3377_s23 = sld [smem:[#allocation50_spill]] }
 0x596   : > { %p2185_p13 = scmp.ge.s32.totalorder %s2670_s16, 2 }
 0x59b   : > { %s1418_s22 = sand.u32 1, %s3376_s29   ;;  %p3378_p0 = scmp.ne.s32.totalorder %s3377_s23, 0 }
 0x59c   : > { %s1419_s3 = scalar_lea.sflag [#allocation9], %s1418_s22 }
 0x59d   : > { %p2176_p6 = pnand %p2185_p13, %p3378_p0 }
 0x59f   : > { %2645 = dma.done.wait (!%p2176_p6), %s1419_s3, 128  }
 0x5a0   : > { %2647 = vsyncadd (!%p2176_p6), %s1419_s3, 4294967168  ;;  %s28_s16 = sadd.s32 1, %s2670_s16   ;;  %s3379_s21 = sld [smem:[#allocation47_spill]] }
 0x5a1   : > { %p25_p8 = scmp.ge.s32.totalorder %s28_s16, 4   ;;  %s3380_s13 = sld [smem:[#allocation51_spill]] }
 0x5a2   : > { %s3381_s14 = sld [smem:[#allocation48_spill]]  ;;  %s3382_s15 = sld [smem:[#allocation49_spill]] }
 0x5a3   : > { %s3383_s11 = smov %s2654_s12  ;;  %27 = sbr.rel (!%p25_p8) target bundleno = 20 (0x14), region = 151 }
 0x5a6   : > { %s3384_s12 = smov %s3379_s21 }
 0x5aa   :  { %1424 = vsyncpa [#allocation8], 1 }
 0x5ab   :  { %1426 = vsyncpa [#allocation8 + $0x1], 1 }
 0x5ac   :  { %1427 = vsyncpa [#allocation11], 1 }
 0x5ad   :  { %1428 = vsyncpa [#allocation9], 1 }
 0x5ae   :  { %1430 = vsyncpa [#allocation9 + $0x1], 1 }
 0x5af   :  { %1431 = vsyncpa [#allocation14], 1 }
 0x5b0   :  { %1432 = vsyncmov [#allocation4] }
 0x5b3   :  { %s1433_s20 = vpop.sfrf %1432 }
 0x5b4   :  { %p1596_p2 = scmp.ne.s32.totalorder %s1433_s20, 0 }
 0x5b6   :  { %1437 = shalt.err (%p1596_p2)  }
 0x5b7   :  { %1439 = vsyncmov [#allocation4 + $0x1] }
 0x5ba   :  { %s1440_s17 = vpop.sfrf %1439 }
 0x5bb   :  { %p1597_p5 = scmp.ne.s32.totalorder %s1440_s17, 0 }
 0x5bd   :  { %1444 = shalt.err (%p1597_p5)  }
 0x5be   :  { %1446 = vsyncmov [#allocation4 + $0x2] }
 0x5c1   :  { %s1447_s2 = vpop.sfrf %1446 }
 0x5c2   :  { %p1598_p9 = scmp.ne.s32.totalorder %s1447_s2, 0 }
 0x5c4   :  { %1451 = shalt.err (%p1598_p9)  }
 0x5c5   :  { %1453 = vsyncmov [#allocation4 + $0x3] }
 0x5c8   :  { %s1454_s16 = vpop.sfrf %1453 }
 0x5c9   :  { %p1599_p10 = scmp.ne.s32.totalorder %s1454_s16, 0 }
 0x5cb   :  { %1458 = shalt.err (%p1599_p10)  }
 0x5cc   :  { %1460 = vsyncmov [#allocation4 + $0x4] }
 0x5cf   :  { %s1461_s1 = vpop.sfrf %1460 }
 0x5d0   :  { %p1600_p12 = scmp.ne.s32.totalorder %s1461_s1, 0 }
 0x5d2   :  { %1465 = shalt.err (%p1600_p12)  }
 0x5d3   :  { %1467 = vsyncmov [#allocation4 + $0x5] }
 0x5d6   :  { %s1468_s4 = vpop.sfrf %1467 }
 0x5d7   :  { %p1601_p1 = scmp.ne.s32.totalorder %s1468_s4, 0 }
 0x5d9   :  { %1472 = shalt.err (%p1601_p1)  }
 0x5da   :  { %1474 = vsyncmov [#allocation4 + $0x6] }
 0x5dd   :  { %s1475_s5 = vpop.sfrf %1474 }
 0x5de   :  { %p1602_p3 = scmp.ne.s32.totalorder %s1475_s5, 0 }
 0x5e0   :  { %1479 = shalt.err (%p1602_p3)  }
 0x5e1   :  { %1481 = vsyncmov [#allocation4 + $0x7] }
 0x5e4   :  { %s1482_s6 = vpop.sfrf %1481 }
 0x5e5   :  { %p1603_p4 = scmp.ne.s32.totalorder %s1482_s6, 0 }
 0x5e7   :  { %1486 = shalt.err (%p1603_p4)  }

</bundles_post_ra>
